<compile_context>
chip_gen: v5e
topology: v5e:2x2
jax: 0.10.0
libtpu: 0.0.40
codegen_flags: <defaults>
</compile_context>

<pallas_src>
import functools
import math

import jax
import jax.numpy as jnp
import numpy as np
from jax.experimental import pallas as pl
from jax.experimental.pallas import tpu as pltpu

EPS = 1e-5                       # PyTorch nn.LayerNorm default
MATMUL_DTYPE = jnp.bfloat16      # MXU operand dtype (accumulation is f32)
VMEM_LIMIT = 64 * 1024 * 1024    # above the 16/32 MiB scoped defaults
NEG_INF = -1e9


def _compiler_params(semantics):
    return pltpu.CompilerParams(dimension_semantics=semantics,
                                vmem_limit_bytes=VMEM_LIMIT)


# ----------------------------------------------------------------------------
# tiling helpers
# ----------------------------------------------------------------------------
def _pick_tile(dim, target, align):
    """Largest tile <= target that is a multiple of `align` and divides `dim`.
    TODO(synk): for awkward non-divisible dims switch to pl.cdiv grids with a
    masked tail instead of falling back to the full dimension."""
    if dim <= target:
        return dim
    t = (target // align) * align
    while t >= align:
        if dim % t == 0:
            return t
        t -= align
    return dim


# ----------------------------------------------------------------------------
# Pallas kernels
# ----------------------------------------------------------------------------
def _linear_kernel(x_ref, w_ref, b_ref, o_ref, acc_ref):
    """Tiled  [M,K] @ [K,N] + b  with K-reduction f32 accumulator."""
    k = pl.program_id(2)

    @pl.when(k == 0)
    def _():
        acc_ref[...] = jnp.zeros_like(acc_ref)

    acc_ref[...] += jnp.dot(
        x_ref[...].astype(MATMUL_DTYPE),
        w_ref[...].astype(MATMUL_DTYPE),
        preferred_element_type=jnp.float32,
    )

    @pl.when(k == pl.num_programs(2) - 1)
    def _():
        o_ref[...] = (acc_ref[...] + b_ref[...]).astype(o_ref.dtype)


def _attn_proj_ln_kernel(q_ref, k_ref, v_ref, res_ref, wo_ref, bo_ref,
                         g_ref, bln_ref, o_ref, *, num_heads, causal):
    """One batch element per grid step: multi-head attention + output
    projection + residual-add + LayerNorm, all fused.

    The attention scale is already folded into wq/bq.  Per-head results are
    folded straight into the output projection (acc += ctx_h @ wo_rows_h), so
    there is no concatenate and the accumulator stays lane-dense (full D)."""
    q = q_ref[0]                              # (Sq, D)   bf16
    k = k_ref[0]                              # (Skv, D)  bf16
    v = v_ref[0]                              # (Skv, D)  bf16
    sq, d_model = q.shape
    skv = k.shape[0]
    dh = d_model // num_heads

    if causal:
        row = jax.lax.broadcasted_iota(jnp.int32, (sq, skv), 0)
        col = jax.lax.broadcasted_iota(jnp.int32, (sq, skv), 1)
        neg = jnp.where(col > row, jnp.float32(NEG_INF), jnp.float32(0.0))

    acc = jnp.zeros((sq, d_model), jnp.float32)
    for h in range(num_heads):                # static unroll (num_heads small)
        lo = h * dh
        qh = q[:, lo:lo + dh]
        kh = k[:, lo:lo + dh]
        vh = v[:, lo:lo + dh]
        s = jax.lax.dot_general(
            qh, kh, (((1,), (1,)), ((), ())),
            preferred_element_type=jnp.float32,
        )                                     # (Sq, Skv), no transpose of K
        if causal:
            s = s + neg
        s = s - jnp.max(s, axis=-1, keepdims=True)
        p = jnp.exp(s)
        inv = pl.reciprocal(jnp.sum(p, axis=-1, keepdims=True), approx=True)
        ctx = jnp.dot(p.astype(v.dtype), vh,
                      preferred_element_type=jnp.float32)      # (Sq, dh)
        ctx = ctx * inv                       # normalize after p@V (dh-wide)
        acc = acc + jnp.dot(ctx.astype(MATMUL_DTYPE),
                            wo_ref[lo:lo + dh, :].astype(MATMUL_DTYPE),
                            preferred_element_type=jnp.float32)

    y = acc + bo_ref[...] + res_ref[0]        # residual in f32
    mu = jnp.mean(y, axis=-1, keepdims=True)
    var = jnp.mean((y - mu) * (y - mu), axis=-1, keepdims=True)
    o_ref[0] = ((y - mu) * jax.lax.rsqrt(var + EPS) * g_ref[...]
                + bln_ref[...]).astype(o_ref.dtype)


def _ffn_res_ln_kernel(x_ref, w1_ref, b1_ref, w2_ref, b2_ref, g_ref, bln_ref,
                       o_ref, acc_ref):
    """FFN (Linear -> ReLU -> Linear) tiled over the hidden dim F, with fused
    residual-add + LayerNorm epilogue.  Grid = (M-tiles, F-tiles)."""
    f = pl.program_id(1)

    @pl.when(f == 0)
    def _():
        acc_ref[...] = jnp.zeros_like(acc_ref)

    h = jnp.dot(
        x_ref[...].astype(MATMUL_DTYPE),
        w1_ref[...].astype(MATMUL_DTYPE),
        preferred_element_type=jnp.float32,
    ) + b1_ref[...]
    h = jnp.maximum(h, 0.0)
    acc_ref[...] += jnp.dot(
        h.astype(MATMUL_DTYPE),
        w2_ref[...].astype(MATMUL_DTYPE),
        preferred_element_type=jnp.float32,
    )

    @pl.when(f == pl.num_programs(1) - 1)
    def _():
        y = acc_ref[...] + b2_ref[...] + x_ref[...]   # residual = FFN input
        mu = jnp.mean(y, axis=-1, keepdims=True)
        var = jnp.mean((y - mu) * (y - mu), axis=-1, keepdims=True)
        o_ref[...] = ((y - mu) * jax.lax.rsqrt(var + EPS) * g_ref[...]
                      + bln_ref[...]).astype(o_ref.dtype)


# ----------------------------------------------------------------------------
# pallas_call wrappers
# ----------------------------------------------------------------------------
def pallas_linear(x2d, w, b):
    """[M,K] f32 @ [K,N] bf16 + b -> [M,N] bf16 (intermediate projections)."""
    M, K = x2d.shape
    N = w.shape[1]
    tm = _pick_tile(M, 256, 16)
    tn = _pick_tile(N, 512, 128)
    tk = _pick_tile(K, 512, 128)
    grid = (M // tm, N // tn, K // tk)
    cost = pl.CostEstimate(
        flops=2 * M * N * K,
        transcendentals=0,
        bytes_accessed=4 * M * K + 2 * K * N + 2 * M * N + 4 * N,
    )
    return pl.pallas_call(
        _linear_kernel,
        out_shape=jax.ShapeDtypeStruct((M, N), jnp.bfloat16),
        grid=grid,
        in_specs=[
            pl.BlockSpec((tm, tk), lambda i, j, k: (i, k)),
            pl.BlockSpec((tk, tn), lambda i, j, k: (k, j)),
            pl.BlockSpec((1, tn), lambda i, j, k: (0, j)),
        ],
        out_specs=pl.BlockSpec((tm, tn), lambda i, j, k: (i, j)),
        scratch_shapes=[pltpu.VMEM((tm, tn), jnp.float32)],
        compiler_params=_compiler_params(("parallel", "parallel", "arbitrary")),
        cost_estimate=cost,
    )(x2d, w, b.reshape(1, N))


def pallas_attn_proj_ln(q_arr, kv_arr, k_blk, v_blk, res, wo, bo, gamma, beta,
                        *, num_heads, causal):
    """Fused MHA + output projection + residual + LayerNorm.
    q/k/v are selected out of the fused projection outputs purely via
    BlockSpec block indices (no JAX-level slicing)."""
    B, Sq, D = res.shape
    Skv = kv_arr.shape[1]
    kernel = functools.partial(_attn_proj_ln_kernel,
                               num_heads=num_heads, causal=causal)
    cost = pl.CostEstimate(
        flops=B * (4 * Sq * Skv * D + 2 * Sq * D * D) + 8 * B * Sq * D,
        transcendentals=B * num_heads * Sq * Skv + B * Sq,
        bytes_accessed=(2 * B * (Sq + 2 * Skv) * D   # bf16 q/k/v
                        + 4 * 2 * B * Sq * D         # f32 residual + output
                        + 2 * D * D + 4 * 3 * D),
    )
    return pl.pallas_call(
        kernel,
        out_shape=jax.ShapeDtypeStruct((B, Sq, D), jnp.float32),
        grid=(B,),
        in_specs=[
            pl.BlockSpec((1, Sq, D), lambda b: (b, 0, 0)),        # q
            pl.BlockSpec((1, Skv, D), lambda b: (b, 0, k_blk)),   # k
            pl.BlockSpec((1, Skv, D), lambda b: (b, 0, v_blk)),   # v
            pl.BlockSpec((1, Sq, D), lambda b: (b, 0, 0)),        # residual
            pl.BlockSpec((D, D), lambda b: (0, 0)),               # wo
            pl.BlockSpec((1, D), lambda b: (0, 0)),               # bo
            pl.BlockSpec((1, D), lambda b: (0, 0)),               # gamma
            pl.BlockSpec((1, D), lambda b: (0, 0)),               # beta
        ],
        out_specs=pl.BlockSpec((1, Sq, D), lambda b: (b, 0, 0)),
        compiler_params=_compiler_params(("parallel",)),
        cost_estimate=cost,
    )(q_arr, kv_arr, kv_arr, res, wo, bo.reshape(1, D),
      gamma.reshape(1, D), beta.reshape(1, D))


def pallas_ffn_res_ln(x2d, w1, b1, w2, b2, gamma, beta):
    M, D = x2d.shape
    F = w1.shape[1]
    tm = _pick_tile(M, 256, 16)
    tf = _pick_tile(F, 256, 128)   # 256-target keeps double-buffered weight
    grid = (M // tm, F // tf)      # blocks inside v7x's 64 MiB VMEM
    cost = pl.CostEstimate(
        flops=4 * M * D * F + 8 * M * D,
        transcendentals=M,
        bytes_accessed=4 * 2 * M * D + 2 * 2 * D * F + 4 * F + 4 * 3 * D,
    )
    return pl.pallas_call(
        _ffn_res_ln_kernel,
        out_shape=jax.ShapeDtypeStruct((M, D), jnp.float32),
        grid=grid,
        in_specs=[
            pl.BlockSpec((tm, D), lambda i, f: (i, 0)),
            pl.BlockSpec((D, tf), lambda i, f: (0, f)),
            pl.BlockSpec((1, tf), lambda i, f: (0, f)),
            pl.BlockSpec((tf, D), lambda i, f: (f, 0)),
            pl.BlockSpec((1, D), lambda i, f: (0, 0)),
            pl.BlockSpec((1, D), lambda i, f: (0, 0)),
            pl.BlockSpec((1, D), lambda i, f: (0, 0)),
        ],
        out_specs=pl.BlockSpec((tm, D), lambda i, f: (i, 0)),
        scratch_shapes=[pltpu.VMEM((tm, D), jnp.float32)],
        compiler_params=_compiler_params(("parallel", "arbitrary")),
        cost_estimate=cost,
    )(x2d, w1, b1.reshape(1, F), w2, b2.reshape(1, D),
      gamma.reshape(1, D), beta.reshape(1, D))


# ----------------------------------------------------------------------------
# DecoderLayer forward (glue in plain JAX, compute in Pallas)
# ----------------------------------------------------------------------------
def mha_block(x_q, x_kv, p, num_heads, *, self_attention, causal,
              ln_gamma, ln_beta):
    B, Sq, D = x_q.shape
    Skv = x_kv.shape[1]
    xq2 = x_q.reshape(B * Sq, D)

    if self_attention:
        qkv = pallas_linear(xq2, p["wqkv"], p["bqkv"]).reshape(B, Sq, 3 * D)
        q_arr, kv_arr, k_blk, v_blk = qkv, qkv, 1, 2
    else:
        q_arr = pallas_linear(xq2, p["wq"], p["bq"]).reshape(B, Sq, D)
        kv_arr = pallas_linear(x_kv.reshape(B * Skv, D),
                               p["wkv"], p["bkv"]).reshape(B, Skv, 2 * D)
        k_blk, v_blk = 0, 1

    return pallas_attn_proj_ln(q_arr, kv_arr, k_blk, v_blk, x_q,
                               p["wo"], p["bo"], ln_gamma, ln_beta,
                               num_heads=num_heads, causal=causal)


def decoder_layer(x, enc_output, params, num_heads):
    # Dropout is identity (inference).  trg_mask is the standard causal mask
    # (generated in-kernel); src_mask is None (no masking).
    B, S, D = x.shape

    x = mha_block(x, x, params["self_attn"], num_heads,
                  self_attention=True, causal=True,
                  ln_gamma=params["ln1_g"], ln_beta=params["ln1_b"])

    x = mha_block(x, enc_output, params["cross_attn"], num_heads,
                  self_attention=False, causal=False,
                  ln_gamma=params["ln2_g"], ln_beta=params["ln2_b"])

    x = pallas_ffn_res_ln(
        x.reshape(B * S, D),
        params["w1"], params["b1"], params["w2"], params["b2"],
        params["ln3_g"], params["ln3_b"]).reshape(B, S, D)
    return x


# ----------------------------------------------------------------------------
# Pure-JAX f32 reference (for correctness check)
# ----------------------------------------------------------------------------
def ref_mha(x_q, x_kv, p, mask_add, num_heads):
    B, Sq, D = x_q.shape
    Skv = x_kv.shape[1]
    Dh = D // num_heads
    q = x_q.reshape(B * Sq, D) @ p["wq"] + p["bq"]
    k = x_kv.reshape(B * Skv, D) @ p["wk"] + p["bk"]
    v = x_kv.reshape(B * Skv, D) @ p["wv"] + p["bv"]
    q = q.reshape(B, Sq, num_heads, Dh).transpose(0, 2, 1, 3)
    k = k.reshape(B, Skv, num_heads, Dh).transpose(0, 2, 1, 3)
    v = v.reshape(B, Skv, num_heads, Dh).transpose(0, 2, 1, 3)
    scores = jnp.einsum("bhqd,bhkd->bhqk", q, k) / math.sqrt(Dh) + mask_add[0]
    p_attn = jax.nn.softmax(scores, axis=-1)
    ctx = jnp.einsum("bhqk,bhkd->bhqd", p_attn, v)
    ctx = ctx.transpose(0, 2, 1, 3).reshape(B * Sq, D)
    return (ctx @ p["wo"] + p["bo"]).reshape(B, Sq, D)


def ref_layernorm(y, g, b):
    mu = jnp.mean(y, axis=-1, keepdims=True)
    var = jnp.mean((y - mu) ** 2, axis=-1, keepdims=True)
    return (y - mu) * jax.lax.rsqrt(var + EPS) * g + b


def ref_decoder_layer(x, enc, params, trg_mask_add, src_mask_add, num_heads):
    x = ref_layernorm(
        x + ref_mha(x, x, params["self_attn"], trg_mask_add, num_heads),
        params["ln1_g"], params["ln1_b"])
    x = ref_layernorm(
        x + ref_mha(x, enc, params["cross_attn"], src_mask_add, num_heads),
        params["ln2_g"], params["ln2_b"])
    h = jnp.maximum(x @ params["w1"] + params["b1"], 0.0)
    ff = h @ params["w2"] + params["b2"]
    x = ref_layernorm(x + ff, params["ln3_g"], params["ln3_b"])
    return x


# ----------------------------------------------------------------------------
# Deterministic parameter init + fusion (QKV concat, scale fold, bf16 weights)
# ----------------------------------------------------------------------------
def init_params(key, d_model, d_ff):
    ks = jax.random.split(key, 4)

    def lin(k, din, dout):
        kw, kb = jax.random.split(k)
        return (jax.random.normal(kw, (din, dout), jnp.float32) * 0.05,
                jax.random.normal(kb, (dout,), jnp.float32) * 0.01)

    def mha(k):
        k0, k1, k2, k3 = jax.random.split(k, 4)
        wq, bq = lin(k0, d_model, d_model)
        wk, bk = lin(k1, d_model, d_model)
        wv, bv = lin(k2, d_model, d_model)
        wo, bo = lin(k3, d_model, d_model)
        return dict(wq=wq, bq=bq, wk=wk, bk=bk, wv=wv, bv=bv, wo=wo, bo=bo)

    w1, b1 = lin(ks[2], d_model, d_ff)
    w2, b2 = lin(ks[3], d_ff, d_model)
    ones = jnp.ones((d_model,), jnp.float32)
    zeros = jnp.zeros((d_model,), jnp.float32)
    return dict(
        self_attn=mha(ks[0]), cross_attn=mha(ks[1]),
        w1=w1, b1=b1, w2=w2, b2=b2,
        ln1_g=ones, ln1_b=zeros, ln2_g=ones, ln2_b=zeros,
        ln3_g=ones, ln3_b=zeros,
    )


def fuse_params(params, num_heads):
    """Concatenate Q/K/V weights, fold 1/sqrt(dh) into wq/bq, cast matmul
    weights to bf16 (biases / LN params stay f32)."""
    d_model = params["self_attn"]["wq"].shape[0]
    scale = 1.0 / math.sqrt(d_model // num_heads)
    bf16 = lambda w: w.astype(jnp.bfloat16)
    sa, ca = params["self_attn"], params["cross_attn"]
    fused = dict(params)
    fused["self_attn"] = dict(
        wqkv=bf16(jnp.concatenate([sa["wq"] * scale, sa["wk"], sa["wv"]], axis=1)),
        bqkv=jnp.concatenate([sa["bq"] * scale, sa["bk"], sa["bv"]], axis=0),
        wo=bf16(sa["wo"]), bo=sa["bo"])
    fused["cross_attn"] = dict(
        wq=bf16(ca["wq"] * scale), bq=ca["bq"] * scale,
        wkv=bf16(jnp.concatenate([ca["wk"], ca["wv"]], axis=1)),
        bkv=jnp.concatenate([ca["bk"], ca["bv"]], axis=0),
        wo=bf16(ca["wo"]), bo=ca["bo"])
    fused["w1"] = bf16(params["w1"])
    fused["w2"] = bf16(params["w2"])
    return fused


# ----------------------------------------------------------------------------
if __name__ == "__main__":
    # batch, seq, d_model, num_heads, d_ff (d_model multiple of 128 so the
    # BlockSpec column selection of the fused QKV output is lane-aligned)
    B, S, D, H, F = 2, 8, 128, 4, 256

    key = jax.random.PRNGKey(0)
    kx, ke, kp = jax.random.split(key, 3)
    x = jax.random.normal(kx, (B, S, D), jnp.float32)
    enc_output = jax.random.normal(ke, (B, S, D), jnp.float32)
    params = init_params(kp, D, F)
    fused = fuse_params(params, H)

    fwd = jax.jit(functools.partial(decoder_layer, num_heads=H))
    out = jax.block_until_ready(fwd(x, enc_output, fused))

    # Reference: trg_mask = causal (-1e9 on future positions), src_mask = None.
    causal = jnp.tril(jnp.ones((S, S), jnp.float32))
    trg_mask_add = jnp.where(causal == 0, NEG_INF, 0.0)[None, :, :]
    src_mask_add = jnp.zeros((1, S, S), jnp.float32)
    ref = ref_decoder_layer(x, enc_output, params, trg_mask_add, src_mask_add, H)

    # bf16 MXU operands vs. the f32 reference -> relaxed tolerance.
    np.testing.assert_allclose(np.asarray(out), np.asarray(ref),
                               rtol=5e-2, atol=5e-2)
    print("KERNEL_OK")
</pallas_src>

<mosaic_0001>
module attributes {stable_mosaic.version = 11 : i64} {
  func.func @_linear_kernel(%arg0: i32, %arg1: i32, %arg2: i32, %arg3: memref<16x128xf32, #tpu.memory_space<vmem>>, %arg4: memref<128x256xbf16, #tpu.memory_space<vmem>>, %arg5: memref<1x256xf32, #tpu.memory_space<vmem>>, %arg6: memref<16x256xbf16, #tpu.memory_space<vmem>>, %arg7: memref<16x256xf32, #tpu.memory_space<vmem>>) attributes {dimension_semantics = [#tpu.dimension_semantics<parallel>, #tpu.dimension_semantics<parallel>, #tpu.dimension_semantics<arbitrary>], iteration_bounds = array<i64: 1, 1, 1>, scalar_prefetch = 0 : i64, scratch_operands = 1 : i64, tpu.core_type = #tpu.core_type<tc>, window_params = [{transform_indices = @transform_0, window_bounds = array<i64: 16, 128>}, {transform_indices = @transform_1, window_bounds = array<i64: 128, 256>}, {transform_indices = @transform_2, window_bounds = array<i64: 1, 256>}, {transform_indices = @transform_3, window_bounds = array<i64: 16, 256>}]} {
    %c0_i32 = arith.constant 0 : i32
    %0 = arith.cmpi eq, %arg2, %c0_i32 : i32
    %1 = arith.extui %0 : i1 to i32
    %c0_i32_0 = arith.constant 0 : i32
    %2 = arith.cmpi ne, %1, %c0_i32_0 : i32
    scf.if %2 {
      %cst_10 = arith.constant 0.000000e+00 : f32
      %13 = vector.broadcast %cst_10 : f32 to vector<16x256xf32>
      %c0_11 = arith.constant 0 : index
      %c0_12 = arith.constant 0 : index
      %14 = vector.load %arg7[%c0_11, %c0_12] : memref<16x256xf32, #tpu.memory_space<vmem>>, vector<16x256xf32>
      tpu.vector_store %arg7[%c0_11, %c0_12], %13 {strides = array<i32>} : memref<16x256xf32, #tpu.memory_space<vmem>>, vector<16x256xf32>,
    } else {
    }
    %c0 = arith.constant 0 : index
    %c0_1 = arith.constant 0 : index
    %3 = vector.load %arg7[%c0, %c0_1] : memref<16x256xf32, #tpu.memory_space<vmem>>, vector<16x256xf32>
    %c0_2 = arith.constant 0 : index
    %c0_3 = arith.constant 0 : index
    %4 = vector.load %arg3[%c0_2, %c0_3] : memref<16x128xf32, #tpu.memory_space<vmem>>, vector<16x128xf32>
    %5 = arith.truncf %4 : vector<16x128xf32> to vector<16x128xbf16>
    %c0_4 = arith.constant 0 : index
    %c0_5 = arith.constant 0 : index
    %6 = vector.load %arg4[%c0_4, %c0_5] : memref<128x256xbf16, #tpu.memory_space<vmem>>, vector<128x256xbf16>
    %cst = arith.constant dense<0.000000e+00> : vector<16x256xf32>
    %7 = tpu.matmul %5, %6, %cst {dimension_numbers = #tpu.dot_dimension_numbers<[1], [0], [0], [1], [0, 0, 1, 1], [], []>} : vector<16x128xbf16>, vector<128x256xbf16>, vector<16x256xf32> -> vector<16x256xf32>
    %8 = arith.addf %3, %7 : vector<16x256xf32>
    %c0_6 = arith.constant 0 : index
    %c0_7 = arith.constant 0 : index
    %9 = vector.load %arg7[%c0_6, %c0_7] : memref<16x256xf32, #tpu.memory_space<vmem>>, vector<16x256xf32>
    tpu.vector_store %arg7[%c0_6, %c0_7], %8 {strides = array<i32>} : memref<16x256xf32, #tpu.memory_space<vmem>>, vector<16x256xf32>,
    %c0_i32_8 = arith.constant 0 : i32
    %10 = arith.cmpi eq, %arg2, %c0_i32_8 : i32
    %11 = arith.extui %10 : i1 to i32
    %c0_i32_9 = arith.constant 0 : i32
    %12 = arith.cmpi ne, %11, %c0_i32_9 : i32
    scf.if %12 {
      %c0_10 = arith.constant 0 : index
      %c0_11 = arith.constant 0 : index
      %13 = vector.load %arg7[%c0_10, %c0_11] : memref<16x256xf32, #tpu.memory_space<vmem>>, vector<16x256xf32>
      %c0_12 = arith.constant 0 : index
      %c0_13 = arith.constant 0 : index
      %14 = vector.load %arg5[%c0_12, %c0_13] : memref<1x256xf32, #tpu.memory_space<vmem>>, vector<1x256xf32>
      %15 = vector.broadcast %14 : vector<1x256xf32> to vector<16x256xf32>
      %16 = arith.addf %13, %15 : vector<16x256xf32>
      %17 = arith.truncf %16 : vector<16x256xf32> to vector<16x256xbf16>
      %c0_14 = arith.constant 0 : index
      %c0_15 = arith.constant 0 : index
      %18 = vector.load %arg6[%c0_14, %c0_15] : memref<16x256xbf16, #tpu.memory_space<vmem>>, vector<16x256xbf16>
      tpu.vector_store %arg6[%c0_14, %c0_15], %17 {strides = array<i32>} : memref<16x256xbf16, #tpu.memory_space<vmem>>, vector<16x256xbf16>,
    } else {
    }
    return
  }
  func.func @transform_0(%arg0: i32, %arg1: i32, %arg2: i32) -> (i32, i32) {
    %c0_i32 = arith.constant 0 : i32
    return %arg0, %arg2 : i32, i32
  }
  func.func @transform_1(%arg0: i32, %arg1: i32, %arg2: i32) -> (i32, i32) {
    %c0_i32 = arith.constant 0 : i32
    return %arg2, %arg1 : i32, i32
  }
  func.func @transform_2(%arg0: i32, %arg1: i32, %arg2: i32) -> (i32, i32) {
    %c0_i32 = arith.constant 0 : i32
    %c0_i32_0 = arith.constant 0 : i32
    return %c0_i32, %arg1 : i32, i32
  }
  func.func @transform_3(%arg0: i32, %arg1: i32, %arg2: i32) -> (i32, i32) {
    %c0_i32 = arith.constant 0 : i32
    return %arg0, %arg1 : i32, i32
  }
}

module attributes {stable_mosaic.version = 11 : i64} {
  func.func @_linear_kernel(%arg0: i32, %arg1: i32, %arg2: i32, %arg3: memref<16x128xf32, #tpu.memory_space<vmem>>, %arg4: memref<128x384xbf16, #tpu.memory_space<vmem>>, %arg5: memref<1x384xf32, #tpu.memory_space<vmem>>, %arg6: memref<16x384xbf16, #tpu.memory_space<vmem>>, %arg7: memref<16x384xf32, #tpu.memory_space<vmem>>) attributes {dimension_semantics = [#tpu.dimension_semantics<parallel>, #tpu.dimension_semantics<parallel>, #tpu.dimension_semantics<arbitrary>], iteration_bounds = array<i64: 1, 1, 1>, scalar_prefetch = 0 : i64, scratch_operands = 1 : i64, tpu.core_type = #tpu.core_type<tc>, window_params = [{transform_indices = @transform_0, window_bounds = array<i64: 16, 128>}, {transform_indices = @transform_1, window_bounds = array<i64: 128, 384>}, {transform_indices = @transform_2, window_bounds = array<i64: 1, 384>}, {transform_indices = @transform_3, window_bounds = array<i64: 16, 384>}]} {
    %c0_i32 = arith.constant 0 : i32
    %0 = arith.cmpi eq, %arg2, %c0_i32 : i32
    %1 = arith.extui %0 : i1 to i32
    %c0_i32_0 = arith.constant 0 : i32
    %2 = arith.cmpi ne, %1, %c0_i32_0 : i32
    scf.if %2 {
      %cst_10 = arith.constant 0.000000e+00 : f32
      %13 = vector.broadcast %cst_10 : f32 to vector<16x384xf32>
      %c0_11 = arith.constant 0 : index
      %c0_12 = arith.constant 0 : index
      %14 = vector.load %arg7[%c0_11, %c0_12] : memref<16x384xf32, #tpu.memory_space<vmem>>, vector<16x384xf32>
      tpu.vector_store %arg7[%c0_11, %c0_12], %13 {strides = array<i32>} : memref<16x384xf32, #tpu.memory_space<vmem>>, vector<16x384xf32>,
    } else {
    }
    %c0 = arith.constant 0 : index
    %c0_1 = arith.constant 0 : index
    %3 = vector.load %arg7[%c0, %c0_1] : memref<16x384xf32, #tpu.memory_space<vmem>>, vector<16x384xf32>
    %c0_2 = arith.constant 0 : index
    %c0_3 = arith.constant 0 : index
    %4 = vector.load %arg3[%c0_2, %c0_3] : memref<16x128xf32, #tpu.memory_space<vmem>>, vector<16x128xf32>
    %5 = arith.truncf %4 : vector<16x128xf32> to vector<16x128xbf16>
    %c0_4 = arith.constant 0 : index
    %c0_5 = arith.constant 0 : index
    %6 = vector.load %arg4[%c0_4, %c0_5] : memref<128x384xbf16, #tpu.memory_space<vmem>>, vector<128x384xbf16>
    %cst = arith.constant dense<0.000000e+00> : vector<16x384xf32>
    %7 = tpu.matmul %5, %6, %cst {dimension_numbers = #tpu.dot_dimension_numbers<[1], [0], [0], [1], [0, 0, 1, 1], [], []>} : vector<16x128xbf16>, vector<128x384xbf16>, vector<16x384xf32> -> vector<16x384xf32>
    %8 = arith.addf %3, %7 : vector<16x384xf32>
    %c0_6 = arith.constant 0 : index
    %c0_7 = arith.constant 0 : index
    %9 = vector.load %arg7[%c0_6, %c0_7] : memref<16x384xf32, #tpu.memory_space<vmem>>, vector<16x384xf32>
    tpu.vector_store %arg7[%c0_6, %c0_7], %8 {strides = array<i32>} : memref<16x384xf32, #tpu.memory_space<vmem>>, vector<16x384xf32>,
    %c0_i32_8 = arith.constant 0 : i32
    %10 = arith.cmpi eq, %arg2, %c0_i32_8 : i32
    %11 = arith.extui %10 : i1 to i32
    %c0_i32_9 = arith.constant 0 : i32
    %12 = arith.cmpi ne, %11, %c0_i32_9 : i32
    scf.if %12 {
      %c0_10 = arith.constant 0 : index
      %c0_11 = arith.constant 0 : index
      %13 = vector.load %arg7[%c0_10, %c0_11] : memref<16x384xf32, #tpu.memory_space<vmem>>, vector<16x384xf32>
      %c0_12 = arith.constant 0 : index
      %c0_13 = arith.constant 0 : index
      %14 = vector.load %arg5[%c0_12, %c0_13] : memref<1x384xf32, #tpu.memory_space<vmem>>, vector<1x384xf32>
      %15 = vector.broadcast %14 : vector<1x384xf32> to vector<16x384xf32>
      %16 = arith.addf %13, %15 : vector<16x384xf32>
      %17 = arith.truncf %16 : vector<16x384xf32> to vector<16x384xbf16>
      %c0_14 = arith.constant 0 : index
      %c0_15 = arith.constant 0 : index
      %18 = vector.load %arg6[%c0_14, %c0_15] : memref<16x384xbf16, #tpu.memory_space<vmem>>, vector<16x384xbf16>
      tpu.vector_store %arg6[%c0_14, %c0_15], %17 {strides = array<i32>} : memref<16x384xbf16, #tpu.memory_space<vmem>>, vector<16x384xbf16>,
    } else {
    }
    return
  }
  func.func @transform_0(%arg0: i32, %arg1: i32, %arg2: i32) -> (i32, i32) {
    %c0_i32 = arith.constant 0 : i32
    return %arg0, %arg2 : i32, i32
  }
  func.func @transform_1(%arg0: i32, %arg1: i32, %arg2: i32) -> (i32, i32) {
    %c0_i32 = arith.constant 0 : i32
    return %arg2, %arg1 : i32, i32
  }
  func.func @transform_2(%arg0: i32, %arg1: i32, %arg2: i32) -> (i32, i32) {
    %c0_i32 = arith.constant 0 : i32
    %c0_i32_0 = arith.constant 0 : i32
    return %c0_i32, %arg1 : i32, i32
  }
  func.func @transform_3(%arg0: i32, %arg1: i32, %arg2: i32) -> (i32, i32) {
    %c0_i32 = arith.constant 0 : i32
    return %arg0, %arg1 : i32, i32
  }
}

module attributes {stable_mosaic.version = 11 : i64} {
  func.func @_attn_proj_ln_kernel(%arg0: i32, %arg1: memref<1x8x128xbf16, #tpu.memory_space<vmem>>, %arg2: memref<1x8x128xbf16, #tpu.memory_space<vmem>>, %arg3: memref<1x8x128xbf16, #tpu.memory_space<vmem>>, %arg4: memref<1x8x128xf32, #tpu.memory_space<vmem>>, %arg5: memref<128x128xbf16, #tpu.memory_space<vmem>>, %arg6: memref<1x128xf32, #tpu.memory_space<vmem>>, %arg7: memref<1x128xf32, #tpu.memory_space<vmem>>, %arg8: memref<1x128xf32, #tpu.memory_space<vmem>>, %arg9: memref<1x8x128xf32, #tpu.memory_space<vmem>>) attributes {dimension_semantics = [#tpu.dimension_semantics<parallel>], iteration_bounds = array<i64: 2>, scalar_prefetch = 0 : i64, scratch_operands = 0 : i64, tpu.core_type = #tpu.core_type<tc>, window_params = [{transform_indices = @transform_0, window_bounds = array<i64: 1, 8, 128>}, {transform_indices = @transform_1, window_bounds = array<i64: 1, 8, 128>}, {transform_indices = @transform_2, window_bounds = array<i64: 1, 8, 128>}, {transform_indices = @transform_3, window_bounds = array<i64: 1, 8, 128>}, {pipeline_mode = #tpu.pipeline_mode<synchronous>, transform_indices = @transform_4, window_bounds = array<i64: 128, 128>}, {pipeline_mode = #tpu.pipeline_mode<synchronous>, transform_indices = @transform_5, window_bounds = array<i64: 1, 128>}, {pipeline_mode = #tpu.pipeline_mode<synchronous>, transform_indices = @transform_6, window_bounds = array<i64: 1, 128>}, {pipeline_mode = #tpu.pipeline_mode<synchronous>, transform_indices = @transform_7, window_bounds = array<i64: 1, 128>}, {transform_indices = @transform_8, window_bounds = array<i64: 1, 8, 128>}]} {
    %c0 = arith.constant 0 : index
    %c0_0 = arith.constant 0 : index
    %c0_1 = arith.constant 0 : index
    %0 = vector.load %arg1[%c0, %c0_0, %c0_1] : memref<1x8x128xbf16, #tpu.memory_space<vmem>>, vector<1x8x128xbf16>
    %1 = vector.shape_cast %0 : vector<1x8x128xbf16> to vector<8x128xbf16>
    %c0_2 = arith.constant 0 : index
    %c0_3 = arith.constant 0 : index
    %c0_4 = arith.constant 0 : index
    %2 = vector.load %arg2[%c0_2, %c0_3, %c0_4] : memref<1x8x128xbf16, #tpu.memory_space<vmem>>, vector<1x8x128xbf16>
    %3 = vector.shape_cast %2 : vector<1x8x128xbf16> to vector<8x128xbf16>
    %c0_5 = arith.constant 0 : index
    %c0_6 = arith.constant 0 : index
    %c0_7 = arith.constant 0 : index
    %4 = vector.load %arg3[%c0_5, %c0_6, %c0_7] : memref<1x8x128xbf16, #tpu.memory_space<vmem>>, vector<1x8x128xbf16>
    %5 = vector.shape_cast %4 : vector<1x8x128xbf16> to vector<8x128xbf16>
    %6 = tpu.iota {dimensions = array<i32: 0>} : vector<8x8xi32>
    %7 = tpu.iota {dimensions = array<i32: 1>} : vector<8x8xi32>
    %8 = arith.cmpi sgt, %7, %6 : vector<8x8xi32>
    %cst = arith.constant -1.000000e+09 : f32
    %cst_8 = arith.constant 0.000000e+00 : f32
    %9 = vector.broadcast %cst : f32 to vector<8x8xf32>
    %10 = vector.broadcast %cst_8 : f32 to vector<8x8xf32>
    %11 = arith.select %8, %9, %10 : vector<8x8xi1>, vector<8x8xf32>
    %cst_9 = arith.constant 0.000000e+00 : f32
    %12 = vector.broadcast %cst_9 : f32 to vector<8x128xf32>
    %13 = vector.extract_strided_slice %1 {offsets = [0, 0], sizes = [8, 32], strides = [1, 1]} : vector<8x128xbf16> to vector<8x32xbf16>
    %14 = vector.extract_strided_slice %3 {offsets = [0, 0], sizes = [8, 32], strides = [1, 1]} : vector<8x128xbf16> to vector<8x32xbf16>
    %15 = vector.extract_strided_slice %5 {offsets = [0, 0], sizes = [8, 32], strides = [1, 1]} : vector<8x128xbf16> to vector<8x32xbf16>
    %cst_10 = arith.constant dense<0.000000e+00> : vector<8x8xf32>
    %16 = tpu.matmul %13, %14, %cst_10 {dimension_numbers = #tpu.dot_dimension_numbers<[1], [1], [0], [0], [0, 0, 1, 0], [], []>} : vector<8x32xbf16>, vector<8x32xbf16>, vector<8x8xf32> -> vector<8x8xf32>
    %17 = arith.addf %16, %11 : vector<8x8xf32>
    %cst_11 = arith.constant dense<0xFF800000> : vector<8xf32>
    %18 = vector.multi_reduction <maximumf>, %17, %cst_11 [1] : vector<8x8xf32> to vector<8xf32>
    %19 = vector.shape_cast %18 : vector<8xf32> to vector<8x1xf32>
    %20 = vector.broadcast %19 : vector<8x1xf32> to vector<8x8xf32>
    %21 = arith.subf %17, %20 : vector<8x8xf32>
    %22 = math.exp %21 : vector<8x8xf32>
    %cst_12 = arith.constant dense<0.000000e+00> : vector<8xf32>
    %23 = vector.multi_reduction <add>, %22, %cst_12 [1] : vector<8x8xf32> to vector<8xf32>
    %24 = vector.shape_cast %23 : vector<8xf32> to vector<8x1xf32>
    %25 = tpu.reciprocal %24 {approx = true} : vector<8x1xf32> -> vector<8x1xf32>
    %26 = arith.truncf %22 : vector<8x8xf32> to vector<8x8xbf16>
    %cst_13 = arith.constant dense<0.000000e+00> : vector<8x32xf32>
    %27 = tpu.matmul %26, %15, %cst_13 {dimension_numbers = #tpu.dot_dimension_numbers<[1], [0], [0], [1], [0, 0, 1, 1], [], []>} : vector<8x8xbf16>, vector<8x32xbf16>, vector<8x32xf32> -> vector<8x32xf32>
    %28 = vector.broadcast %25 : vector<8x1xf32> to vector<8x32xf32>
    %29 = arith.mulf %27, %28 : vector<8x32xf32>
    %30 = arith.truncf %29 : vector<8x32xf32> to vector<8x32xbf16>
    %c0_14 = arith.constant 0 : index
    %c0_15 = arith.constant 0 : index
    %31 = vector.load %arg5[%c0_14, %c0_15] : memref<128x128xbf16, #tpu.memory_space<vmem>>, vector<32x128xbf16>
    %cst_16 = arith.constant dense<0.000000e+00> : vector<8x128xf32>
    %32 = tpu.matmul %30, %31, %cst_16 {dimension_numbers = #tpu.dot_dimension_numbers<[1], [0], [0], [1], [0, 0, 1, 1], [], []>} : vector<8x32xbf16>, vector<32x128xbf16>, vector<8x128xf32> -> vector<8x128xf32>
    %33 = arith.addf %12, %32 : vector<8x128xf32>
    %34 = vector.extract_strided_slice %1 {offsets = [0, 32], sizes = [8, 32], strides = [1, 1]} : vector<8x128xbf16> to vector<8x32xbf16>
    %35 = vector.extract_strided_slice %3 {offsets = [0, 32], sizes = [8, 32], strides = [1, 1]} : vector<8x128xbf16> to vector<8x32xbf16>
    %36 = vector.extract_strided_slice %5 {offsets = [0, 32], sizes = [8, 32], strides = [1, 1]} : vector<8x128xbf16> to vector<8x32xbf16>
    %cst_17 = arith.constant dense<0.000000e+00> : vector<8x8xf32>
    %37 = tpu.matmul %34, %35, %cst_17 {dimension_numbers = #tpu.dot_dimension_numbers<[1], [1], [0], [0], [0, 0, 1, 0], [], []>} : vector<8x32xbf16>, vector<8x32xbf16>, vector<8x8xf32> -> vector<8x8xf32>
    %38 = arith.addf %37, %11 : vector<8x8xf32>
    %cst_18 = arith.constant dense<0xFF800000> : vector<8xf32>
    %39 = vector.multi_reduction <maximumf>, %38, %cst_18 [1] : vector<8x8xf32> to vector<8xf32>
    %40 = vector.shape_cast %39 : vector<8xf32> to vector<8x1xf32>
    %41 = vector.broadcast %40 : vector<8x1xf32> to vector<8x8xf32>
    %42 = arith.subf %38, %41 : vector<8x8xf32>
    %43 = math.exp %42 : vector<8x8xf32>
    %cst_19 = arith.constant dense<0.000000e+00> : vector<8xf32>
    %44 = vector.multi_reduction <add>, %43, %cst_19 [1] : vector<8x8xf32> to vector<8xf32>
    %45 = vector.shape_cast %44 : vector<8xf32> to vector<8x1xf32>
    %46 = tpu.reciprocal %45 {approx = true} : vector<8x1xf32> -> vector<8x1xf32>
    %47 = arith.truncf %43 : vector<8x8xf32> to vector<8x8xbf16>
    %cst_20 = arith.constant dense<0.000000e+00> : vector<8x32xf32>
    %48 = tpu.matmul %47, %36, %cst_20 {dimension_numbers = #tpu.dot_dimension_numbers<[1], [0], [0], [1], [0, 0, 1, 1], [], []>} : vector<8x8xbf16>, vector<8x32xbf16>, vector<8x32xf32> -> vector<8x32xf32>
    %49 = vector.broadcast %46 : vector<8x1xf32> to vector<8x32xf32>
    %50 = arith.mulf %48, %49 : vector<8x32xf32>
    %51 = arith.truncf %50 : vector<8x32xf32> to vector<8x32xbf16>
    %c32 = arith.constant 32 : index
    %c0_21 = arith.constant 0 : index
    %52 = vector.load %arg5[%c32, %c0_21] : memref<128x128xbf16, #tpu.memory_space<vmem>>, vector<32x128xbf16>
    %cst_22 = arith.constant dense<0.000000e+00> : vector<8x128xf32>
    %53 = tpu.matmul %51, %52, %cst_22 {dimension_numbers = #tpu.dot_dimension_numbers<[1], [0], [0], [1], [0, 0, 1, 1], [], []>} : vector<8x32xbf16>, vector<32x128xbf16>, vector<8x128xf32> -> vector<8x128xf32>
    %54 = arith.addf %33, %53 : vector<8x128xf32>
    %55 = vector.extract_strided_slice %1 {offsets = [0, 64], sizes = [8, 32], strides = [1, 1]} : vector<8x128xbf16> to vector<8x32xbf16>
    %56 = vector.extract_strided_slice %3 {offsets = [0, 64], sizes = [8, 32], strides = [1, 1]} : vector<8x128xbf16> to vector<8x32xbf16>
    %57 = vector.extract_strided_slice %5 {offsets = [0, 64], sizes = [8, 32], strides = [1, 1]} : vector<8x128xbf16> to vector<8x32xbf16>
    %cst_23 = arith.constant dense<0.000000e+00> : vector<8x8xf32>
    %58 = tpu.matmul %55, %56, %cst_23 {dimension_numbers = #tpu.dot_dimension_numbers<[1], [1], [0], [0], [0, 0, 1, 0], [], []>} : vector<8x32xbf16>, vector<8x32xbf16>, vector<8x8xf32> -> vector<8x8xf32>
    %59 = arith.addf %58, %11 : vector<8x8xf32>
    %cst_24 = arith.constant dense<0xFF800000> : vector<8xf32>
    %60 = vector.multi_reduction <maximumf>, %59, %cst_24 [1] : vector<8x8xf32> to vector<8xf32>
    %61 = vector.shape_cast %60 : vector<8xf32> to vector<8x1xf32>
    %62 = vector.broadcast %61 : vector<8x1xf32> to vector<8x8xf32>
    %63 = arith.subf %59, %62 : vector<8x8xf32>
    %64 = math.exp %63 : vector<8x8xf32>
    %cst_25 = arith.constant dense<0.000000e+00> : vector<8xf32>
    %65 = vector.multi_reduction <add>, %64, %cst_25 [1] : vector<8x8xf32> to vector<8xf32>
    %66 = vector.shape_cast %65 : vector<8xf32> to vector<8x1xf32>
    %67 = tpu.reciprocal %66 {approx = true} : vector<8x1xf32> -> vector<8x1xf32>
    %68 = arith.truncf %64 : vector<8x8xf32> to vector<8x8xbf16>
    %cst_26 = arith.constant dense<0.000000e+00> : vector<8x32xf32>
    %69 = tpu.matmul %68, %57, %cst_26 {dimension_numbers = #tpu.dot_dimension_numbers<[1], [0], [0], [1], [0, 0, 1, 1], [], []>} : vector<8x8xbf16>, vector<8x32xbf16>, vector<8x32xf32> -> vector<8x32xf32>
    %70 = vector.broadcast %67 : vector<8x1xf32> to vector<8x32xf32>
    %71 = arith.mulf %69, %70 : vector<8x32xf32>
    %72 = arith.truncf %71 : vector<8x32xf32> to vector<8x32xbf16>
    %c64 = arith.constant 64 : index
    %c0_27 = arith.constant 0 : index
    %73 = vector.load %arg5[%c64, %c0_27] : memref<128x128xbf16, #tpu.memory_space<vmem>>, vector<32x128xbf16>
    %cst_28 = arith.constant dense<0.000000e+00> : vector<8x128xf32>
    %74 = tpu.matmul %72, %73, %cst_28 {dimension_numbers = #tpu.dot_dimension_numbers<[1], [0], [0], [1], [0, 0, 1, 1], [], []>} : vector<8x32xbf16>, vector<32x128xbf16>, vector<8x128xf32> -> vector<8x128xf32>
    %75 = arith.addf %54, %74 : vector<8x128xf32>
    %76 = vector.extract_strided_slice %1 {offsets = [0, 96], sizes = [8, 32], strides = [1, 1]} : vector<8x128xbf16> to vector<8x32xbf16>
    %77 = vector.extract_strided_slice %3 {offsets = [0, 96], sizes = [8, 32], strides = [1, 1]} : vector<8x128xbf16> to vector<8x32xbf16>
    %78 = vector.extract_strided_slice %5 {offsets = [0, 96], sizes = [8, 32], strides = [1, 1]} : vector<8x128xbf16> to vector<8x32xbf16>
    %cst_29 = arith.constant dense<0.000000e+00> : vector<8x8xf32>
    %79 = tpu.matmul %76, %77, %cst_29 {dimension_numbers = #tpu.dot_dimension_numbers<[1], [1], [0], [0], [0, 0, 1, 0], [], []>} : vector<8x32xbf16>, vector<8x32xbf16>, vector<8x8xf32> -> vector<8x8xf32>
    %80 = arith.addf %79, %11 : vector<8x8xf32>
    %cst_30 = arith.constant dense<0xFF800000> : vector<8xf32>
    %81 = vector.multi_reduction <maximumf>, %80, %cst_30 [1] : vector<8x8xf32> to vector<8xf32>
    %82 = vector.shape_cast %81 : vector<8xf32> to vector<8x1xf32>
    %83 = vector.broadcast %82 : vector<8x1xf32> to vector<8x8xf32>
    %84 = arith.subf %80, %83 : vector<8x8xf32>
    %85 = math.exp %84 : vector<8x8xf32>
    %cst_31 = arith.constant dense<0.000000e+00> : vector<8xf32>
    %86 = vector.multi_reduction <add>, %85, %cst_31 [1] : vector<8x8xf32> to vector<8xf32>
    %87 = vector.shape_cast %86 : vector<8xf32> to vector<8x1xf32>
    %88 = tpu.reciprocal %87 {approx = true} : vector<8x1xf32> -> vector<8x1xf32>
    %89 = arith.truncf %85 : vector<8x8xf32> to vector<8x8xbf16>
    %cst_32 = arith.constant dense<0.000000e+00> : vector<8x32xf32>
    %90 = tpu.matmul %89, %78, %cst_32 {dimension_numbers = #tpu.dot_dimension_numbers<[1], [0], [0], [1], [0, 0, 1, 1], [], []>} : vector<8x8xbf16>, vector<8x32xbf16>, vector<8x32xf32> -> vector<8x32xf32>
    %91 = vector.broadcast %88 : vector<8x1xf32> to vector<8x32xf32>
    %92 = arith.mulf %90, %91 : vector<8x32xf32>
    %93 = arith.truncf %92 : vector<8x32xf32> to vector<8x32xbf16>
    %c96 = arith.constant 96 : index
    %c0_33 = arith.constant 0 : index
    %94 = vector.load %arg5[%c96, %c0_33] : memref<128x128xbf16, #tpu.memory_space<vmem>>, vector<32x128xbf16>
    %cst_34 = arith.constant dense<0.000000e+00> : vector<8x128xf32>
    %95 = tpu.matmul %93, %94, %cst_34 {dimension_numbers = #tpu.dot_dimension_numbers<[1], [0], [0], [1], [0, 0, 1, 1], [], []>} : vector<8x32xbf16>, vector<32x128xbf16>, vector<8x128xf32> -> vector<8x128xf32>
    %96 = arith.addf %75, %95 : vector<8x128xf32>
    %c0_35 = arith.constant 0 : index
    %c0_36 = arith.constant 0 : index
    %97 = vector.load %arg6[%c0_35, %c0_36] : memref<1x128xf32, #tpu.memory_space<vmem>>, vector<1x128xf32>
    %98 = vector.broadcast %97 : vector<1x128xf32> to vector<8x128xf32>
    %99 = arith.addf %96, %98 : vector<8x128xf32>
    %c0_37 = arith.constant 0 : index
    %c0_38 = arith.constant 0 : index
    %c0_39 = arith.constant 0 : index
    %100 = vector.load %arg4[%c0_37, %c0_38, %c0_39] : memref<1x8x128xf32, #tpu.memory_space<vmem>>, vector<1x8x128xf32>
    %101 = vector.shape_cast %100 : vector<1x8x128xf32> to vector<8x128xf32>
    %102 = arith.addf %99, %101 : vector<8x128xf32>
    %cst_40 = arith.constant dense<0.000000e+00> : vector<8xf32>
    %103 = vector.multi_reduction <add>, %102, %cst_40 [1] : vector<8x128xf32> to vector<8xf32>
    %104 = vector.shape_cast %103 : vector<8xf32> to vector<8x1xf32>
    %cst_41 = arith.constant 1.280000e+02 : f32
    %105 = vector.broadcast %cst_41 : f32 to vector<8x1xf32>
    %106 = arith.divf %104, %105 : vector<8x1xf32>
    %107 = vector.broadcast %106 : vector<8x1xf32> to vector<8x128xf32>
    %108 = arith.subf %102, %107 : vector<8x128xf32>
    %109 = vector.broadcast %106 : vector<8x1xf32> to vector<8x128xf32>
    %110 = arith.subf %102, %109 : vector<8x128xf32>
    %111 = arith.mulf %108, %110 : vector<8x128xf32>
    %cst_42 = arith.constant dense<0.000000e+00> : vector<8xf32>
    %112 = vector.multi_reduction <add>, %111, %cst_42 [1] : vector<8x128xf32> to vector<8xf32>
    %113 = vector.shape_cast %112 : vector<8xf32> to vector<8x1xf32>
    %cst_43 = arith.constant 1.280000e+02 : f32
    %114 = vector.broadcast %cst_43 : f32 to vector<8x1xf32>
    %115 = arith.divf %113, %114 : vector<8x1xf32>
    %116 = vector.broadcast %106 : vector<8x1xf32> to vector<8x128xf32>
    %117 = arith.subf %102, %116 : vector<8x128xf32>
    %cst_44 = arith.constant 9.99999974E-6 : f32
    %118 = vector.broadcast %cst_44 : f32 to vector<8x1xf32>
    %119 = arith.addf %115, %118 : vector<8x1xf32>
    %120 = math.rsqrt %119 : vector<8x1xf32>
    %121 = vector.broadcast %120 : vector<8x1xf32> to vector<8x128xf32>
    %122 = arith.mulf %117, %121 : vector<8x128xf32>
    %c0_45 = arith.constant 0 : index
    %c0_46 = arith.constant 0 : index
    %123 = vector.load %arg7[%c0_45, %c0_46] : memref<1x128xf32, #tpu.memory_space<vmem>>, vector<1x128xf32>
    %124 = vector.broadcast %123 : vector<1x128xf32> to vector<8x128xf32>
    %125 = arith.mulf %122, %124 : vector<8x128xf32>
    %c0_47 = arith.constant 0 : index
    %c0_48 = arith.constant 0 : index
    %126 = vector.load %arg8[%c0_47, %c0_48] : memref<1x128xf32, #tpu.memory_space<vmem>>, vector<1x128xf32>
    %127 = vector.broadcast %126 : vector<1x128xf32> to vector<8x128xf32>
    %128 = arith.addf %125, %127 : vector<8x128xf32>
    %c0_49 = arith.constant 0 : index
    %c0_50 = arith.constant 0 : index
    %c0_51 = arith.constant 0 : index
    %129 = vector.load %arg9[%c0_49, %c0_50, %c0_51] : memref<1x8x128xf32, #tpu.memory_space<vmem>>, vector<1x8x128xf32>
    %130 = vector.shape_cast %129 : vector<1x8x128xf32> to vector<8x128xf32>
    %131 = vector.shape_cast %128 : vector<8x128xf32> to vector<1x8x128xf32>
    tpu.vector_store %arg9[%c0_49, %c0_50, %c0_51], %131 {strides = array<i32>} : memref<1x8x128xf32, #tpu.memory_space<vmem>>, vector<1x8x128xf32>,
    return
  }
  func.func @transform_0(%arg0: i32) -> (i32, i32, i32) {
    %c0_i32 = arith.constant 0 : i32
    %c0_i32_0 = arith.constant 0 : i32
    %c0_i32_1 = arith.constant 0 : i32
    return %arg0, %c0_i32, %c0_i32_0 : i32, i32, i32
  }
  func.func @transform_1(%arg0: i32) -> (i32, i32, i32) {
    %c0_i32 = arith.constant 0 : i32
    %c1_i32 = arith.constant 1 : i32
    %c0_i32_0 = arith.constant 0 : i32
    return %arg0, %c0_i32, %c1_i32 : i32, i32, i32
  }
  func.func @transform_2(%arg0: i32) -> (i32, i32, i32) {
    %c0_i32 = arith.constant 0 : i32
    %c2_i32 = arith.constant 2 : i32
    %c0_i32_0 = arith.constant 0 : i32
    return %arg0, %c0_i32, %c2_i32 : i32, i32, i32
  }
  func.func @transform_3(%arg0: i32) -> (i32, i32, i32) {
    %c0_i32 = arith.constant 0 : i32
    %c0_i32_0 = arith.constant 0 : i32
    %c0_i32_1 = arith.constant 0 : i32
    return %arg0, %c0_i32, %c0_i32_0 : i32, i32, i32
  }
  func.func @transform_4(%arg0: i32) -> (i32, i32) {
    %c0_i32 = arith.constant 0 : i32
    %c0_i32_0 = arith.constant 0 : i32
    %c0_i32_1 = arith.constant 0 : i32
    return %c0_i32, %c0_i32_0 : i32, i32
  }
  func.func @transform_5(%arg0: i32) -> (i32, i32) {
    %c0_i32 = arith.constant 0 : i32
    %c0_i32_0 = arith.constant 0 : i32
    %c0_i32_1 = arith.constant 0 : i32
    return %c0_i32, %c0_i32_0 : i32, i32
  }
  func.func @transform_6(%arg0: i32) -> (i32, i32) {
    %c0_i32 = arith.constant 0 : i32
    %c0_i32_0 = arith.constant 0 : i32
    %c0_i32_1 = arith.constant 0 : i32
    return %c0_i32, %c0_i32_0 : i32, i32
  }
  func.func @transform_7(%arg0: i32) -> (i32, i32) {
    %c0_i32 = arith.constant 0 : i32
    %c0_i32_0 = arith.constant 0 : i32
    %c0_i32_1 = arith.constant 0 : i32
    return %c0_i32, %c0_i32_0 : i32, i32
  }
  func.func @transform_8(%arg0: i32) -> (i32, i32, i32) {
    %c0_i32 = arith.constant 0 : i32
    %c0_i32_0 = arith.constant 0 : i32
    %c0_i32_1 = arith.constant 0 : i32
    return %arg0, %c0_i32, %c0_i32_0 : i32, i32, i32
  }
}

module attributes {stable_mosaic.version = 11 : i64} {
  func.func @_linear_kernel(%arg0: i32, %arg1: i32, %arg2: i32, %arg3: memref<16x128xf32, #tpu.memory_space<vmem>>, %arg4: memref<128x128xbf16, #tpu.memory_space<vmem>>, %arg5: memref<1x128xf32, #tpu.memory_space<vmem>>, %arg6: memref<16x128xbf16, #tpu.memory_space<vmem>>, %arg7: memref<16x128xf32, #tpu.memory_space<vmem>>) attributes {dimension_semantics = [#tpu.dimension_semantics<parallel>, #tpu.dimension_semantics<parallel>, #tpu.dimension_semantics<arbitrary>], iteration_bounds = array<i64: 1, 1, 1>, scalar_prefetch = 0 : i64, scratch_operands = 1 : i64, tpu.core_type = #tpu.core_type<tc>, window_params = [{transform_indices = @transform_0, window_bounds = array<i64: 16, 128>}, {transform_indices = @transform_1, window_bounds = array<i64: 128, 128>}, {transform_indices = @transform_2, window_bounds = array<i64: 1, 128>}, {transform_indices = @transform_3, window_bounds = array<i64: 16, 128>}]} {
    %c0_i32 = arith.constant 0 : i32
    %0 = arith.cmpi eq, %arg2, %c0_i32 : i32
    %1 = arith.extui %0 : i1 to i32
    %c0_i32_0 = arith.constant 0 : i32
    %2 = arith.cmpi ne, %1, %c0_i32_0 : i32
    scf.if %2 {
      %cst_10 = arith.constant 0.000000e+00 : f32
      %13 = vector.broadcast %cst_10 : f32 to vector<16x128xf32>
      %c0_11 = arith.constant 0 : index
      %c0_12 = arith.constant 0 : index
      %14 = vector.load %arg7[%c0_11, %c0_12] : memref<16x128xf32, #tpu.memory_space<vmem>>, vector<16x128xf32>
      tpu.vector_store %arg7[%c0_11, %c0_12], %13 {strides = array<i32>} : memref<16x128xf32, #tpu.memory_space<vmem>>, vector<16x128xf32>,
    } else {
    }
    %c0 = arith.constant 0 : index
    %c0_1 = arith.constant 0 : index
    %3 = vector.load %arg7[%c0, %c0_1] : memref<16x128xf32, #tpu.memory_space<vmem>>, vector<16x128xf32>
    %c0_2 = arith.constant 0 : index
    %c0_3 = arith.constant 0 : index
    %4 = vector.load %arg3[%c0_2, %c0_3] : memref<16x128xf32, #tpu.memory_space<vmem>>, vector<16x128xf32>
    %5 = arith.truncf %4 : vector<16x128xf32> to vector<16x128xbf16>
    %c0_4 = arith.constant 0 : index
    %c0_5 = arith.constant 0 : index
    %6 = vector.load %arg4[%c0_4, %c0_5] : memref<128x128xbf16, #tpu.memory_space<vmem>>, vector<128x128xbf16>
    %cst = arith.constant dense<0.000000e+00> : vector<16x128xf32>
    %7 = tpu.matmul %5, %6, %cst {dimension_numbers = #tpu.dot_dimension_numbers<[1], [0], [0], [1], [0, 0, 1, 1], [], []>} : vector<16x128xbf16>, vector<128x128xbf16>, vector<16x128xf32> -> vector<16x128xf32>
    %8 = arith.addf %3, %7 : vector<16x128xf32>
    %c0_6 = arith.constant 0 : index
    %c0_7 = arith.constant 0 : index
    %9 = vector.load %arg7[%c0_6, %c0_7] : memref<16x128xf32, #tpu.memory_space<vmem>>, vector<16x128xf32>
    tpu.vector_store %arg7[%c0_6, %c0_7], %8 {strides = array<i32>} : memref<16x128xf32, #tpu.memory_space<vmem>>, vector<16x128xf32>,
    %c0_i32_8 = arith.constant 0 : i32
    %10 = arith.cmpi eq, %arg2, %c0_i32_8 : i32
    %11 = arith.extui %10 : i1 to i32
    %c0_i32_9 = arith.constant 0 : i32
    %12 = arith.cmpi ne, %11, %c0_i32_9 : i32
    scf.if %12 {
      %c0_10 = arith.constant 0 : index
      %c0_11 = arith.constant 0 : index
      %13 = vector.load %arg7[%c0_10, %c0_11] : memref<16x128xf32, #tpu.memory_space<vmem>>, vector<16x128xf32>
      %c0_12 = arith.constant 0 : index
      %c0_13 = arith.constant 0 : index
      %14 = vector.load %arg5[%c0_12, %c0_13] : memref<1x128xf32, #tpu.memory_space<vmem>>, vector<1x128xf32>
      %15 = vector.broadcast %14 : vector<1x128xf32> to vector<16x128xf32>
      %16 = arith.addf %13, %15 : vector<16x128xf32>
      %17 = arith.truncf %16 : vector<16x128xf32> to vector<16x128xbf16>
      %c0_14 = arith.constant 0 : index
      %c0_15 = arith.constant 0 : index
      %18 = vector.load %arg6[%c0_14, %c0_15] : memref<16x128xbf16, #tpu.memory_space<vmem>>, vector<16x128xbf16>
      tpu.vector_store %arg6[%c0_14, %c0_15], %17 {strides = array<i32>} : memref<16x128xbf16, #tpu.memory_space<vmem>>, vector<16x128xbf16>,
    } else {
    }
    return
  }
  func.func @transform_0(%arg0: i32, %arg1: i32, %arg2: i32) -> (i32, i32) {
    %c0_i32 = arith.constant 0 : i32
    return %arg0, %arg2 : i32, i32
  }
  func.func @transform_1(%arg0: i32, %arg1: i32, %arg2: i32) -> (i32, i32) {
    %c0_i32 = arith.constant 0 : i32
    return %arg2, %arg1 : i32, i32
  }
  func.func @transform_2(%arg0: i32, %arg1: i32, %arg2: i32) -> (i32, i32) {
    %c0_i32 = arith.constant 0 : i32
    %c0_i32_0 = arith.constant 0 : i32
    return %c0_i32, %arg1 : i32, i32
  }
  func.func @transform_3(%arg0: i32, %arg1: i32, %arg2: i32) -> (i32, i32) {
    %c0_i32 = arith.constant 0 : i32
    return %arg0, %arg1 : i32, i32
  }
}

module attributes {stable_mosaic.version = 11 : i64} {
  func.func @_ffn_res_ln_kernel(%arg0: i32, %arg1: i32, %arg2: memref<16x128xf32, #tpu.memory_space<vmem>>, %arg3: memref<128x256xbf16, #tpu.memory_space<vmem>>, %arg4: memref<1x256xf32, #tpu.memory_space<vmem>>, %arg5: memref<256x128xbf16, #tpu.memory_space<vmem>>, %arg6: memref<1x128xf32, #tpu.memory_space<vmem>>, %arg7: memref<1x128xf32, #tpu.memory_space<vmem>>, %arg8: memref<1x128xf32, #tpu.memory_space<vmem>>, %arg9: memref<16x128xf32, #tpu.memory_space<vmem>>, %arg10: memref<16x128xf32, #tpu.memory_space<vmem>>) attributes {dimension_semantics = [#tpu.dimension_semantics<parallel>, #tpu.dimension_semantics<arbitrary>], iteration_bounds = array<i64: 1, 1>, scalar_prefetch = 0 : i64, scratch_operands = 1 : i64, tpu.core_type = #tpu.core_type<tc>, window_params = [{transform_indices = @transform_0, window_bounds = array<i64: 16, 128>}, {transform_indices = @transform_1, window_bounds = array<i64: 128, 256>}, {transform_indices = @transform_2, window_bounds = array<i64: 1, 256>}, {transform_indices = @transform_3, window_bounds = array<i64: 256, 128>}, {pipeline_mode = #tpu.pipeline_mode<synchronous>, transform_indices = @transform_4, window_bounds = array<i64: 1, 128>}, {pipeline_mode = #tpu.pipeline_mode<synchronous>, transform_indices = @transform_5, window_bounds = array<i64: 1, 128>}, {pipeline_mode = #tpu.pipeline_mode<synchronous>, transform_indices = @transform_6, window_bounds = array<i64: 1, 128>}, {transform_indices = @transform_7, window_bounds = array<i64: 16, 128>}]} {
    %c0_i32 = arith.constant 0 : i32
    %0 = arith.cmpi eq, %arg1, %c0_i32 : i32
    %1 = arith.extui %0 : i1 to i32
    %c0_i32_0 = arith.constant 0 : i32
    %2 = arith.cmpi ne, %1, %c0_i32_0 : i32
    scf.if %2 {
      %cst_16 = arith.constant 0.000000e+00 : f32
      %21 = vector.broadcast %cst_16 : f32 to vector<16x128xf32>
      %c0_17 = arith.constant 0 : index
      %c0_18 = arith.constant 0 : index
      %22 = vector.load %arg10[%c0_17, %c0_18] : memref<16x128xf32, #tpu.memory_space<vmem>>, vector<16x128xf32>
      tpu.vector_store %arg10[%c0_17, %c0_18], %21 {strides = array<i32>} : memref<16x128xf32, #tpu.memory_space<vmem>>, vector<16x128xf32>,
    } else {
    }
    %c0 = arith.constant 0 : index
    %c0_1 = arith.constant 0 : index
    %3 = vector.load %arg2[%c0, %c0_1] : memref<16x128xf32, #tpu.memory_space<vmem>>, vector<16x128xf32>
    %4 = arith.truncf %3 : vector<16x128xf32> to vector<16x128xbf16>
    %c0_2 = arith.constant 0 : index
    %c0_3 = arith.constant 0 : index
    %5 = vector.load %arg3[%c0_2, %c0_3] : memref<128x256xbf16, #tpu.memory_space<vmem>>, vector<128x256xbf16>
    %cst = arith.constant dense<0.000000e+00> : vector<16x256xf32>
    %6 = tpu.matmul %4, %5, %cst {dimension_numbers = #tpu.dot_dimension_numbers<[1], [0], [0], [1], [0, 0, 1, 1], [], []>} : vector<16x128xbf16>, vector<128x256xbf16>, vector<16x256xf32> -> vector<16x256xf32>
    %c0_4 = arith.constant 0 : index
    %c0_5 = arith.constant 0 : index
    %7 = vector.load %arg4[%c0_4, %c0_5] : memref<1x256xf32, #tpu.memory_space<vmem>>, vector<1x256xf32>
    %8 = vector.broadcast %7 : vector<1x256xf32> to vector<16x256xf32>
    %9 = arith.addf %6, %8 : vector<16x256xf32>
    %cst_6 = arith.constant 0.000000e+00 : f32
    %10 = vector.broadcast %cst_6 : f32 to vector<16x256xf32>
    %11 = arith.maximumf %9, %10 : vector<16x256xf32>
    %c0_7 = arith.constant 0 : index
    %c0_8 = arith.constant 0 : index
    %12 = vector.load %arg10[%c0_7, %c0_8] : memref<16x128xf32, #tpu.memory_space<vmem>>, vector<16x128xf32>
    %13 = arith.truncf %11 : vector<16x256xf32> to vector<16x256xbf16>
    %c0_9 = arith.constant 0 : index
    %c0_10 = arith.constant 0 : index
    %14 = vector.load %arg5[%c0_9, %c0_10] : memref<256x128xbf16, #tpu.memory_space<vmem>>, vector<256x128xbf16>
    %cst_11 = arith.constant dense<0.000000e+00> : vector<16x128xf32>
    %15 = tpu.matmul %13, %14, %cst_11 {dimension_numbers = #tpu.dot_dimension_numbers<[1], [0], [0], [1], [0, 0, 1, 1], [], []>} : vector<16x256xbf16>, vector<256x128xbf16>, vector<16x128xf32> -> vector<16x128xf32>
    %16 = arith.addf %12, %15 : vector<16x128xf32>
    %c0_12 = arith.constant 0 : index
    %c0_13 = arith.constant 0 : index
    %17 = vector.load %arg10[%c0_12, %c0_13] : memref<16x128xf32, #tpu.memory_space<vmem>>, vector<16x128xf32>
    tpu.vector_store %arg10[%c0_12, %c0_13], %16 {strides = array<i32>} : memref<16x128xf32, #tpu.memory_space<vmem>>, vector<16x128xf32>,
    %c0_i32_14 = arith.constant 0 : i32
    %18 = arith.cmpi eq, %arg1, %c0_i32_14 : i32
    %19 = arith.extui %18 : i1 to i32
    %c0_i32_15 = arith.constant 0 : i32
    %20 = arith.cmpi ne, %19, %c0_i32_15 : i32
    scf.if %20 {
      %c0_16 = arith.constant 0 : index
      %c0_17 = arith.constant 0 : index
      %21 = vector.load %arg10[%c0_16, %c0_17] : memref<16x128xf32, #tpu.memory_space<vmem>>, vector<16x128xf32>
      %c0_18 = arith.constant 0 : index
      %c0_19 = arith.constant 0 : index
      %22 = vector.load %arg6[%c0_18, %c0_19] : memref<1x128xf32, #tpu.memory_space<vmem>>, vector<1x128xf32>
      %23 = vector.broadcast %22 : vector<1x128xf32> to vector<16x128xf32>
      %24 = arith.addf %21, %23 : vector<16x128xf32>
      %c0_20 = arith.constant 0 : index
      %c0_21 = arith.constant 0 : index
      %25 = vector.load %arg2[%c0_20, %c0_21] : memref<16x128xf32, #tpu.memory_space<vmem>>, vector<16x128xf32>
      %26 = arith.addf %24, %25 : vector<16x128xf32>
      %cst_22 = arith.constant dense<0.000000e+00> : vector<16xf32>
      %27 = vector.multi_reduction <add>, %26, %cst_22 [1] : vector<16x128xf32> to vector<16xf32>
      %28 = vector.shape_cast %27 : vector<16xf32> to vector<16x1xf32>
      %cst_23 = arith.constant 1.280000e+02 : f32
      %29 = vector.broadcast %cst_23 : f32 to vector<16x1xf32>
      %30 = arith.divf %28, %29 : vector<16x1xf32>
      %31 = vector.broadcast %30 : vector<16x1xf32> to vector<16x128xf32>
      %32 = arith.subf %26, %31 : vector<16x128xf32>
      %33 = vector.broadcast %30 : vector<16x1xf32> to vector<16x128xf32>
      %34 = arith.subf %26, %33 : vector<16x128xf32>
      %35 = arith.mulf %32, %34 : vector<16x128xf32>
      %cst_24 = arith.constant dense<0.000000e+00> : vector<16xf32>
      %36 = vector.multi_reduction <add>, %35, %cst_24 [1] : vector<16x128xf32> to vector<16xf32>
      %37 = vector.shape_cast %36 : vector<16xf32> to vector<16x1xf32>
      %cst_25 = arith.constant 1.280000e+02 : f32
      %38 = vector.broadcast %cst_25 : f32 to vector<16x1xf32>
      %39 = arith.divf %37, %38 : vector<16x1xf32>
      %40 = vector.broadcast %30 : vector<16x1xf32> to vector<16x128xf32>
      %41 = arith.subf %26, %40 : vector<16x128xf32>
      %cst_26 = arith.constant 9.99999974E-6 : f32
      %42 = vector.broadcast %cst_26 : f32 to vector<16x1xf32>
      %43 = arith.addf %39, %42 : vector<16x1xf32>
      %44 = math.rsqrt %43 : vector<16x1xf32>
      %45 = vector.broadcast %44 : vector<16x1xf32> to vector<16x128xf32>
      %46 = arith.mulf %41, %45 : vector<16x128xf32>
      %c0_27 = arith.constant 0 : index
      %c0_28 = arith.constant 0 : index
      %47 = vector.load %arg7[%c0_27, %c0_28] : memref<1x128xf32, #tpu.memory_space<vmem>>, vector<1x128xf32>
      %48 = vector.broadcast %47 : vector<1x128xf32> to vector<16x128xf32>
      %49 = arith.mulf %46, %48 : vector<16x128xf32>
      %c0_29 = arith.constant 0 : index
      %c0_30 = arith.constant 0 : index
      %50 = vector.load %arg8[%c0_29, %c0_30] : memref<1x128xf32, #tpu.memory_space<vmem>>, vector<1x128xf32>
      %51 = vector.broadcast %50 : vector<1x128xf32> to vector<16x128xf32>
      %52 = arith.addf %49, %51 : vector<16x128xf32>
      %c0_31 = arith.constant 0 : index
      %c0_32 = arith.constant 0 : index
      %53 = vector.load %arg9[%c0_31, %c0_32] : memref<16x128xf32, #tpu.memory_space<vmem>>, vector<16x128xf32>
      tpu.vector_store %arg9[%c0_31, %c0_32], %52 {strides = array<i32>} : memref<16x128xf32, #tpu.memory_space<vmem>>, vector<16x128xf32>,
    } else {
    }
    return
  }
  func.func @transform_0(%arg0: i32, %arg1: i32) -> (i32, i32) {
    %c0_i32 = arith.constant 0 : i32
    %c0_i32_0 = arith.constant 0 : i32
    return %arg0, %c0_i32 : i32, i32
  }
  func.func @transform_1(%arg0: i32, %arg1: i32) -> (i32, i32) {
    %c0_i32 = arith.constant 0 : i32
    %c0_i32_0 = arith.constant 0 : i32
    return %c0_i32, %arg1 : i32, i32
  }
  func.func @transform_2(%arg0: i32, %arg1: i32) -> (i32, i32) {
    %c0_i32 = arith.constant 0 : i32
    %c0_i32_0 = arith.constant 0 : i32
    return %c0_i32, %arg1 : i32, i32
  }
  func.func @transform_3(%arg0: i32, %arg1: i32) -> (i32, i32) {
    %c0_i32 = arith.constant 0 : i32
    %c0_i32_0 = arith.constant 0 : i32
    return %arg1, %c0_i32 : i32, i32
  }
  func.func @transform_4(%arg0: i32, %arg1: i32) -> (i32, i32) {
    %c0_i32 = arith.constant 0 : i32
    %c0_i32_0 = arith.constant 0 : i32
    %c0_i32_1 = arith.constant 0 : i32
    return %c0_i32, %c0_i32_0 : i32, i32
  }
  func.func @transform_5(%arg0: i32, %arg1: i32) -> (i32, i32) {
    %c0_i32 = arith.constant 0 : i32
    %c0_i32_0 = arith.constant 0 : i32
    %c0_i32_1 = arith.constant 0 : i32
    return %c0_i32, %c0_i32_0 : i32, i32
  }
  func.func @transform_6(%arg0: i32, %arg1: i32) -> (i32, i32) {
    %c0_i32 = arith.constant 0 : i32
    %c0_i32_0 = arith.constant 0 : i32
    %c0_i32_1 = arith.constant 0 : i32
    return %c0_i32, %c0_i32_0 : i32, i32
  }
  func.func @transform_7(%arg0: i32, %arg1: i32) -> (i32, i32) {
    %c0_i32 = arith.constant 0 : i32
    %c0_i32_0 = arith.constant 0 : i32
    return %arg0, %c0_i32 : i32, i32
  }
}

module attributes {stable_mosaic.version = 11 : i64} {
  func.func @_attn_proj_ln_kernel(%arg0: i32, %arg1: memref<1x8x128xbf16, #tpu.memory_space<vmem>>, %arg2: memref<1x8x128xbf16, #tpu.memory_space<vmem>>, %arg3: memref<1x8x128xbf16, #tpu.memory_space<vmem>>, %arg4: memref<1x8x128xf32, #tpu.memory_space<vmem>>, %arg5: memref<128x128xbf16, #tpu.memory_space<vmem>>, %arg6: memref<1x128xf32, #tpu.memory_space<vmem>>, %arg7: memref<1x128xf32, #tpu.memory_space<vmem>>, %arg8: memref<1x128xf32, #tpu.memory_space<vmem>>, %arg9: memref<1x8x128xf32, #tpu.memory_space<vmem>>) attributes {dimension_semantics = [#tpu.dimension_semantics<parallel>], iteration_bounds = array<i64: 2>, scalar_prefetch = 0 : i64, scratch_operands = 0 : i64, tpu.core_type = #tpu.core_type<tc>, window_params = [{transform_indices = @transform_0, window_bounds = array<i64: 1, 8, 128>}, {transform_indices = @transform_1, window_bounds = array<i64: 1, 8, 128>}, {transform_indices = @transform_2, window_bounds = array<i64: 1, 8, 128>}, {transform_indices = @transform_3, window_bounds = array<i64: 1, 8, 128>}, {pipeline_mode = #tpu.pipeline_mode<synchronous>, transform_indices = @transform_4, window_bounds = array<i64: 128, 128>}, {pipeline_mode = #tpu.pipeline_mode<synchronous>, transform_indices = @transform_5, window_bounds = array<i64: 1, 128>}, {pipeline_mode = #tpu.pipeline_mode<synchronous>, transform_indices = @transform_6, window_bounds = array<i64: 1, 128>}, {pipeline_mode = #tpu.pipeline_mode<synchronous>, transform_indices = @transform_7, window_bounds = array<i64: 1, 128>}, {transform_indices = @transform_8, window_bounds = array<i64: 1, 8, 128>}]} {
    %c0 = arith.constant 0 : index
    %c0_0 = arith.constant 0 : index
    %c0_1 = arith.constant 0 : index
    %0 = vector.load %arg1[%c0, %c0_0, %c0_1] : memref<1x8x128xbf16, #tpu.memory_space<vmem>>, vector<1x8x128xbf16>
    %1 = vector.shape_cast %0 : vector<1x8x128xbf16> to vector<8x128xbf16>
    %c0_2 = arith.constant 0 : index
    %c0_3 = arith.constant 0 : index
    %c0_4 = arith.constant 0 : index
    %2 = vector.load %arg2[%c0_2, %c0_3, %c0_4] : memref<1x8x128xbf16, #tpu.memory_space<vmem>>, vector<1x8x128xbf16>
    %3 = vector.shape_cast %2 : vector<1x8x128xbf16> to vector<8x128xbf16>
    %c0_5 = arith.constant 0 : index
    %c0_6 = arith.constant 0 : index
    %c0_7 = arith.constant 0 : index
    %4 = vector.load %arg3[%c0_5, %c0_6, %c0_7] : memref<1x8x128xbf16, #tpu.memory_space<vmem>>, vector<1x8x128xbf16>
    %5 = vector.shape_cast %4 : vector<1x8x128xbf16> to vector<8x128xbf16>
    %cst = arith.constant 0.000000e+00 : f32
    %6 = vector.broadcast %cst : f32 to vector<8x128xf32>
    %7 = vector.extract_strided_slice %1 {offsets = [0, 0], sizes = [8, 32], strides = [1, 1]} : vector<8x128xbf16> to vector<8x32xbf16>
    %8 = vector.extract_strided_slice %3 {offsets = [0, 0], sizes = [8, 32], strides = [1, 1]} : vector<8x128xbf16> to vector<8x32xbf16>
    %9 = vector.extract_strided_slice %5 {offsets = [0, 0], sizes = [8, 32], strides = [1, 1]} : vector<8x128xbf16> to vector<8x32xbf16>
    %cst_8 = arith.constant dense<0.000000e+00> : vector<8x8xf32>
    %10 = tpu.matmul %7, %8, %cst_8 {dimension_numbers = #tpu.dot_dimension_numbers<[1], [1], [0], [0], [0, 0, 1, 0], [], []>} : vector<8x32xbf16>, vector<8x32xbf16>, vector<8x8xf32> -> vector<8x8xf32>
    %cst_9 = arith.constant dense<0xFF800000> : vector<8xf32>
    %11 = vector.multi_reduction <maximumf>, %10, %cst_9 [1] : vector<8x8xf32> to vector<8xf32>
    %12 = vector.shape_cast %11 : vector<8xf32> to vector<8x1xf32>
    %13 = vector.broadcast %12 : vector<8x1xf32> to vector<8x8xf32>
    %14 = arith.subf %10, %13 : vector<8x8xf32>
    %15 = math.exp %14 : vector<8x8xf32>
    %cst_10 = arith.constant dense<0.000000e+00> : vector<8xf32>
    %16 = vector.multi_reduction <add>, %15, %cst_10 [1] : vector<8x8xf32> to vector<8xf32>
    %17 = vector.shape_cast %16 : vector<8xf32> to vector<8x1xf32>
    %18 = tpu.reciprocal %17 {approx = true} : vector<8x1xf32> -> vector<8x1xf32>
    %19 = arith.truncf %15 : vector<8x8xf32> to vector<8x8xbf16>
    %cst_11 = arith.constant dense<0.000000e+00> : vector<8x32xf32>
    %20 = tpu.matmul %19, %9, %cst_11 {dimension_numbers = #tpu.dot_dimension_numbers<[1], [0], [0], [1], [0, 0, 1, 1], [], []>} : vector<8x8xbf16>, vector<8x32xbf16>, vector<8x32xf32> -> vector<8x32xf32>
    %21 = vector.broadcast %18 : vector<8x1xf32> to vector<8x32xf32>
    %22 = arith.mulf %20, %21 : vector<8x32xf32>
    %23 = arith.truncf %22 : vector<8x32xf32> to vector<8x32xbf16>
    %c0_12 = arith.constant 0 : index
    %c0_13 = arith.constant 0 : index
    %24 = vector.load %arg5[%c0_12, %c0_13] : memref<128x128xbf16, #tpu.memory_space<vmem>>, vector<32x128xbf16>
    %cst_14 = arith.constant dense<0.000000e+00> : vector<8x128xf32>
    %25 = tpu.matmul %23, %24, %cst_14 {dimension_numbers = #tpu.dot_dimension_numbers<[1], [0], [0], [1], [0, 0, 1, 1], [], []>} : vector<8x32xbf16>, vector<32x128xbf16>, vector<8x128xf32> -> vector<8x128xf32>
    %26 = arith.addf %6, %25 : vector<8x128xf32>
    %27 = vector.extract_strided_slice %1 {offsets = [0, 32], sizes = [8, 32], strides = [1, 1]} : vector<8x128xbf16> to vector<8x32xbf16>
    %28 = vector.extract_strided_slice %3 {offsets = [0, 32], sizes = [8, 32], strides = [1, 1]} : vector<8x128xbf16> to vector<8x32xbf16>
    %29 = vector.extract_strided_slice %5 {offsets = [0, 32], sizes = [8, 32], strides = [1, 1]} : vector<8x128xbf16> to vector<8x32xbf16>
    %cst_15 = arith.constant dense<0.000000e+00> : vector<8x8xf32>
    %30 = tpu.matmul %27, %28, %cst_15 {dimension_numbers = #tpu.dot_dimension_numbers<[1], [1], [0], [0], [0, 0, 1, 0], [], []>} : vector<8x32xbf16>, vector<8x32xbf16>, vector<8x8xf32> -> vector<8x8xf32>
    %cst_16 = arith.constant dense<0xFF800000> : vector<8xf32>
    %31 = vector.multi_reduction <maximumf>, %30, %cst_16 [1] : vector<8x8xf32> to vector<8xf32>
    %32 = vector.shape_cast %31 : vector<8xf32> to vector<8x1xf32>
    %33 = vector.broadcast %32 : vector<8x1xf32> to vector<8x8xf32>
    %34 = arith.subf %30, %33 : vector<8x8xf32>
    %35 = math.exp %34 : vector<8x8xf32>
    %cst_17 = arith.constant dense<0.000000e+00> : vector<8xf32>
    %36 = vector.multi_reduction <add>, %35, %cst_17 [1] : vector<8x8xf32> to vector<8xf32>
    %37 = vector.shape_cast %36 : vector<8xf32> to vector<8x1xf32>
    %38 = tpu.reciprocal %37 {approx = true} : vector<8x1xf32> -> vector<8x1xf32>
    %39 = arith.truncf %35 : vector<8x8xf32> to vector<8x8xbf16>
    %cst_18 = arith.constant dense<0.000000e+00> : vector<8x32xf32>
    %40 = tpu.matmul %39, %29, %cst_18 {dimension_numbers = #tpu.dot_dimension_numbers<[1], [0], [0], [1], [0, 0, 1, 1], [], []>} : vector<8x8xbf16>, vector<8x32xbf16>, vector<8x32xf32> -> vector<8x32xf32>
    %41 = vector.broadcast %38 : vector<8x1xf32> to vector<8x32xf32>
    %42 = arith.mulf %40, %41 : vector<8x32xf32>
    %43 = arith.truncf %42 : vector<8x32xf32> to vector<8x32xbf16>
    %c32 = arith.constant 32 : index
    %c0_19 = arith.constant 0 : index
    %44 = vector.load %arg5[%c32, %c0_19] : memref<128x128xbf16, #tpu.memory_space<vmem>>, vector<32x128xbf16>
    %cst_20 = arith.constant dense<0.000000e+00> : vector<8x128xf32>
    %45 = tpu.matmul %43, %44, %cst_20 {dimension_numbers = #tpu.dot_dimension_numbers<[1], [0], [0], [1], [0, 0, 1, 1], [], []>} : vector<8x32xbf16>, vector<32x128xbf16>, vector<8x128xf32> -> vector<8x128xf32>
    %46 = arith.addf %26, %45 : vector<8x128xf32>
    %47 = vector.extract_strided_slice %1 {offsets = [0, 64], sizes = [8, 32], strides = [1, 1]} : vector<8x128xbf16> to vector<8x32xbf16>
    %48 = vector.extract_strided_slice %3 {offsets = [0, 64], sizes = [8, 32], strides = [1, 1]} : vector<8x128xbf16> to vector<8x32xbf16>
    %49 = vector.extract_strided_slice %5 {offsets = [0, 64], sizes = [8, 32], strides = [1, 1]} : vector<8x128xbf16> to vector<8x32xbf16>
    %cst_21 = arith.constant dense<0.000000e+00> : vector<8x8xf32>
    %50 = tpu.matmul %47, %48, %cst_21 {dimension_numbers = #tpu.dot_dimension_numbers<[1], [1], [0], [0], [0, 0, 1, 0], [], []>} : vector<8x32xbf16>, vector<8x32xbf16>, vector<8x8xf32> -> vector<8x8xf32>
    %cst_22 = arith.constant dense<0xFF800000> : vector<8xf32>
    %51 = vector.multi_reduction <maximumf>, %50, %cst_22 [1] : vector<8x8xf32> to vector<8xf32>
    %52 = vector.shape_cast %51 : vector<8xf32> to vector<8x1xf32>
    %53 = vector.broadcast %52 : vector<8x1xf32> to vector<8x8xf32>
    %54 = arith.subf %50, %53 : vector<8x8xf32>
    %55 = math.exp %54 : vector<8x8xf32>
    %cst_23 = arith.constant dense<0.000000e+00> : vector<8xf32>
    %56 = vector.multi_reduction <add>, %55, %cst_23 [1] : vector<8x8xf32> to vector<8xf32>
    %57 = vector.shape_cast %56 : vector<8xf32> to vector<8x1xf32>
    %58 = tpu.reciprocal %57 {approx = true} : vector<8x1xf32> -> vector<8x1xf32>
    %59 = arith.truncf %55 : vector<8x8xf32> to vector<8x8xbf16>
    %cst_24 = arith.constant dense<0.000000e+00> : vector<8x32xf32>
    %60 = tpu.matmul %59, %49, %cst_24 {dimension_numbers = #tpu.dot_dimension_numbers<[1], [0], [0], [1], [0, 0, 1, 1], [], []>} : vector<8x8xbf16>, vector<8x32xbf16>, vector<8x32xf32> -> vector<8x32xf32>
    %61 = vector.broadcast %58 : vector<8x1xf32> to vector<8x32xf32>
    %62 = arith.mulf %60, %61 : vector<8x32xf32>
    %63 = arith.truncf %62 : vector<8x32xf32> to vector<8x32xbf16>
    %c64 = arith.constant 64 : index
    %c0_25 = arith.constant 0 : index
    %64 = vector.load %arg5[%c64, %c0_25] : memref<128x128xbf16, #tpu.memory_space<vmem>>, vector<32x128xbf16>
    %cst_26 = arith.constant dense<0.000000e+00> : vector<8x128xf32>
    %65 = tpu.matmul %63, %64, %cst_26 {dimension_numbers = #tpu.dot_dimension_numbers<[1], [0], [0], [1], [0, 0, 1, 1], [], []>} : vector<8x32xbf16>, vector<32x128xbf16>, vector<8x128xf32> -> vector<8x128xf32>
    %66 = arith.addf %46, %65 : vector<8x128xf32>
    %67 = vector.extract_strided_slice %1 {offsets = [0, 96], sizes = [8, 32], strides = [1, 1]} : vector<8x128xbf16> to vector<8x32xbf16>
    %68 = vector.extract_strided_slice %3 {offsets = [0, 96], sizes = [8, 32], strides = [1, 1]} : vector<8x128xbf16> to vector<8x32xbf16>
    %69 = vector.extract_strided_slice %5 {offsets = [0, 96], sizes = [8, 32], strides = [1, 1]} : vector<8x128xbf16> to vector<8x32xbf16>
    %cst_27 = arith.constant dense<0.000000e+00> : vector<8x8xf32>
    %70 = tpu.matmul %67, %68, %cst_27 {dimension_numbers = #tpu.dot_dimension_numbers<[1], [1], [0], [0], [0, 0, 1, 0], [], []>} : vector<8x32xbf16>, vector<8x32xbf16>, vector<8x8xf32> -> vector<8x8xf32>
    %cst_28 = arith.constant dense<0xFF800000> : vector<8xf32>
    %71 = vector.multi_reduction <maximumf>, %70, %cst_28 [1] : vector<8x8xf32> to vector<8xf32>
    %72 = vector.shape_cast %71 : vector<8xf32> to vector<8x1xf32>
    %73 = vector.broadcast %72 : vector<8x1xf32> to vector<8x8xf32>
    %74 = arith.subf %70, %73 : vector<8x8xf32>
    %75 = math.exp %74 : vector<8x8xf32>
    %cst_29 = arith.constant dense<0.000000e+00> : vector<8xf32>
    %76 = vector.multi_reduction <add>, %75, %cst_29 [1] : vector<8x8xf32> to vector<8xf32>
    %77 = vector.shape_cast %76 : vector<8xf32> to vector<8x1xf32>
    %78 = tpu.reciprocal %77 {approx = true} : vector<8x1xf32> -> vector<8x1xf32>
    %79 = arith.truncf %75 : vector<8x8xf32> to vector<8x8xbf16>
    %cst_30 = arith.constant dense<0.000000e+00> : vector<8x32xf32>
    %80 = tpu.matmul %79, %69, %cst_30 {dimension_numbers = #tpu.dot_dimension_numbers<[1], [0], [0], [1], [0, 0, 1, 1], [], []>} : vector<8x8xbf16>, vector<8x32xbf16>, vector<8x32xf32> -> vector<8x32xf32>
    %81 = vector.broadcast %78 : vector<8x1xf32> to vector<8x32xf32>
    %82 = arith.mulf %80, %81 : vector<8x32xf32>
    %83 = arith.truncf %82 : vector<8x32xf32> to vector<8x32xbf16>
    %c96 = arith.constant 96 : index
    %c0_31 = arith.constant 0 : index
    %84 = vector.load %arg5[%c96, %c0_31] : memref<128x128xbf16, #tpu.memory_space<vmem>>, vector<32x128xbf16>
    %cst_32 = arith.constant dense<0.000000e+00> : vector<8x128xf32>
    %85 = tpu.matmul %83, %84, %cst_32 {dimension_numbers = #tpu.dot_dimension_numbers<[1], [0], [0], [1], [0, 0, 1, 1], [], []>} : vector<8x32xbf16>, vector<32x128xbf16>, vector<8x128xf32> -> vector<8x128xf32>
    %86 = arith.addf %66, %85 : vector<8x128xf32>
    %c0_33 = arith.constant 0 : index
    %c0_34 = arith.constant 0 : index
    %87 = vector.load %arg6[%c0_33, %c0_34] : memref<1x128xf32, #tpu.memory_space<vmem>>, vector<1x128xf32>
    %88 = vector.broadcast %87 : vector<1x128xf32> to vector<8x128xf32>
    %89 = arith.addf %86, %88 : vector<8x128xf32>
    %c0_35 = arith.constant 0 : index
    %c0_36 = arith.constant 0 : index
    %c0_37 = arith.constant 0 : index
    %90 = vector.load %arg4[%c0_35, %c0_36, %c0_37] : memref<1x8x128xf32, #tpu.memory_space<vmem>>, vector<1x8x128xf32>
    %91 = vector.shape_cast %90 : vector<1x8x128xf32> to vector<8x128xf32>
    %92 = arith.addf %89, %91 : vector<8x128xf32>
    %cst_38 = arith.constant dense<0.000000e+00> : vector<8xf32>
    %93 = vector.multi_reduction <add>, %92, %cst_38 [1] : vector<8x128xf32> to vector<8xf32>
    %94 = vector.shape_cast %93 : vector<8xf32> to vector<8x1xf32>
    %cst_39 = arith.constant 1.280000e+02 : f32
    %95 = vector.broadcast %cst_39 : f32 to vector<8x1xf32>
    %96 = arith.divf %94, %95 : vector<8x1xf32>
    %97 = vector.broadcast %96 : vector<8x1xf32> to vector<8x128xf32>
    %98 = arith.subf %92, %97 : vector<8x128xf32>
    %99 = vector.broadcast %96 : vector<8x1xf32> to vector<8x128xf32>
    %100 = arith.subf %92, %99 : vector<8x128xf32>
    %101 = arith.mulf %98, %100 : vector<8x128xf32>
    %cst_40 = arith.constant dense<0.000000e+00> : vector<8xf32>
    %102 = vector.multi_reduction <add>, %101, %cst_40 [1] : vector<8x128xf32> to vector<8xf32>
    %103 = vector.shape_cast %102 : vector<8xf32> to vector<8x1xf32>
    %cst_41 = arith.constant 1.280000e+02 : f32
    %104 = vector.broadcast %cst_41 : f32 to vector<8x1xf32>
    %105 = arith.divf %103, %104 : vector<8x1xf32>
    %106 = vector.broadcast %96 : vector<8x1xf32> to vector<8x128xf32>
    %107 = arith.subf %92, %106 : vector<8x128xf32>
    %cst_42 = arith.constant 9.99999974E-6 : f32
    %108 = vector.broadcast %cst_42 : f32 to vector<8x1xf32>
    %109 = arith.addf %105, %108 : vector<8x1xf32>
    %110 = math.rsqrt %109 : vector<8x1xf32>
    %111 = vector.broadcast %110 : vector<8x1xf32> to vector<8x128xf32>
    %112 = arith.mulf %107, %111 : vector<8x128xf32>
    %c0_43 = arith.constant 0 : index
    %c0_44 = arith.constant 0 : index
    %113 = vector.load %arg7[%c0_43, %c0_44] : memref<1x128xf32, #tpu.memory_space<vmem>>, vector<1x128xf32>
    %114 = vector.broadcast %113 : vector<1x128xf32> to vector<8x128xf32>
    %115 = arith.mulf %112, %114 : vector<8x128xf32>
    %c0_45 = arith.constant 0 : index
    %c0_46 = arith.constant 0 : index
    %116 = vector.load %arg8[%c0_45, %c0_46] : memref<1x128xf32, #tpu.memory_space<vmem>>, vector<1x128xf32>
    %117 = vector.broadcast %116 : vector<1x128xf32> to vector<8x128xf32>
    %118 = arith.addf %115, %117 : vector<8x128xf32>
    %c0_47 = arith.constant 0 : index
    %c0_48 = arith.constant 0 : index
    %c0_49 = arith.constant 0 : index
    %119 = vector.load %arg9[%c0_47, %c0_48, %c0_49] : memref<1x8x128xf32, #tpu.memory_space<vmem>>, vector<1x8x128xf32>
    %120 = vector.shape_cast %119 : vector<1x8x128xf32> to vector<8x128xf32>
    %121 = vector.shape_cast %118 : vector<8x128xf32> to vector<1x8x128xf32>
    tpu.vector_store %arg9[%c0_47, %c0_48, %c0_49], %121 {strides = array<i32>} : memref<1x8x128xf32, #tpu.memory_space<vmem>>, vector<1x8x128xf32>,
    return
  }
  func.func @transform_0(%arg0: i32) -> (i32, i32, i32) {
    %c0_i32 = arith.constant 0 : i32
    %c0_i32_0 = arith.constant 0 : i32
    %c0_i32_1 = arith.constant 0 : i32
    return %arg0, %c0_i32, %c0_i32_0 : i32, i32, i32
  }
  func.func @transform_1(%arg0: i32) -> (i32, i32, i32) {
    %c0_i32 = arith.constant 0 : i32
    %c0_i32_0 = arith.constant 0 : i32
    %c0_i32_1 = arith.constant 0 : i32
    return %arg0, %c0_i32, %c0_i32_0 : i32, i32, i32
  }
  func.func @transform_2(%arg0: i32) -> (i32, i32, i32) {
    %c0_i32 = arith.constant 0 : i32
    %c1_i32 = arith.constant 1 : i32
    %c0_i32_0 = arith.constant 0 : i32
    return %arg0, %c0_i32, %c1_i32 : i32, i32, i32
  }
  func.func @transform_3(%arg0: i32) -> (i32, i32, i32) {
    %c0_i32 = arith.constant 0 : i32
    %c0_i32_0 = arith.constant 0 : i32
    %c0_i32_1 = arith.constant 0 : i32
    return %arg0, %c0_i32, %c0_i32_0 : i32, i32, i32
  }
  func.func @transform_4(%arg0: i32) -> (i32, i32) {
    %c0_i32 = arith.constant 0 : i32
    %c0_i32_0 = arith.constant 0 : i32
    %c0_i32_1 = arith.constant 0 : i32
    return %c0_i32, %c0_i32_0 : i32, i32
  }
  func.func @transform_5(%arg0: i32) -> (i32, i32) {
    %c0_i32 = arith.constant 0 : i32
    %c0_i32_0 = arith.constant 0 : i32
    %c0_i32_1 = arith.constant 0 : i32
    return %c0_i32, %c0_i32_0 : i32, i32
  }
  func.func @transform_6(%arg0: i32) -> (i32, i32) {
    %c0_i32 = arith.constant 0 : i32
    %c0_i32_0 = arith.constant 0 : i32
    %c0_i32_1 = arith.constant 0 : i32
    return %c0_i32, %c0_i32_0 : i32, i32
  }
  func.func @transform_7(%arg0: i32) -> (i32, i32) {
    %c0_i32 = arith.constant 0 : i32
    %c0_i32_0 = arith.constant 0 : i32
    %c0_i32_1 = arith.constant 0 : i32
    return %c0_i32, %c0_i32_0 : i32, i32
  }
  func.func @transform_8(%arg0: i32) -> (i32, i32, i32) {
    %c0_i32 = arith.constant 0 : i32
    %c0_i32_0 = arith.constant 0 : i32
    %c0_i32_1 = arith.constant 0 : i32
    return %arg0, %c0_i32, %c0_i32_0 : i32, i32, i32
  }
}

</mosaic_0001>

<bundles_post_ra>
// kernel: decoder_layer.6
= control target key start
LH: loop header
LB: loop body
LE: loop exit
PB: predicated region body
PF: predicated region fallthrough
CT: control target
= control target key end

     0   :  { %8 = vsyncpa [#allocation4], 0  ;;  %s448_s15 = smov [#allocation3]   ;;  %s449_s17 = smov 128   ;;  %s633_s0 = inlined_call_operand.hbm [shape: f32[16,128], index: 0, kind: input, shape index: {}]   ;;  %s634_s1 = inlined_call_operand.vmem [shape: bf16[128,384], index: 1, kind: input, shape index: {}]   ;;  %s635_s2 = inlined_call_operand.vmem [shape: f32[1,384], index: 2, kind: input, shape index: {}]   ;;  %s636_s3 = inlined_call_operand.vmem [shape: bf16[16,384], index: 3, kind: output, shape index: {}]  }
   0x1   :  { %s13_s14 = sshll.u32 %s633_s0, 4  ;;  %s15_s16 = sshll.u32 %s448_s15, 4  ;;  %s14_s14 = int_to_ptr.hbm [resolvable:$true] %s13_s14  ;;  %s16_s16 = int_to_ptr.vmem [resolvable:$true] %s15_s16 }
   0x2   :  { %s450_s18 = smov 8  }
   0x3   :  { %21 = dma.hbm_to_vmem [thread:$0]  %s14_s14, 256, %s16_s16, [#allocation4], %s449_s17, %s449_s17, %s450_s18  }
   0x4   :  { %446 = dma.done.wait [#allocation4], 256  }
   0x5   :  { %447 = vsyncadd [#allocation4], 4294967040  ;;  %v385_v0 = vld [vmem:[%s634_s1 + $0xa8] sm:$0xf]  ;;  %v417_v1 = vld [vmem:[%s634_s1 + $0xb0] sm:$0xf0] }
   0x6   :  { %v416_v2 = vld [vmem:[%s634_s1 + $0xac] sm:$0xf]  ;;  %v386_v3 = vor.u32 %v417_v1, %v385_v0  ;;  %v387_v4 = vld [vmem:[%s634_s1 + $0xb4] sm:$0xf0]  ;;  %v393_v5 = vld [vmem:[%s634_s1 + $0xb0] sm:$0xf] }
   0x7   :  { %v418_v6 = vld [vmem:[%s634_s1 + $0xb8] sm:$0xf0]  ;;  %v390_v7 = vor.u32 %v416_v2, %v387_v4  ;;  %v373_v9 = vld [vmem:[%s634_s1 + $0x90] sm:$0xf]  ;;  %v413_v11 = vld [vmem:[%s634_s1 + $0x94] sm:$0xf] }
   0x8   :  { %v394_v8 = vor.u32 %v418_v6, %v393_v5  ;;  %v414_v10 = vld [vmem:[%s634_s1 + $0x98] sm:$0xf0]  ;;  %209 = vmatpush.bf16.msra.mxu0 %v386_v3  ;;  %v375_v13 = vld [vmem:[%s634_s1 + $0x9c] sm:$0xf0]  ;;  %v381_v14 = vld [vmem:[%s634_s1 + $0x98] sm:$0xf] }
   0x9   :  { %v374_v12 = vor.u32 %v414_v10, %v373_v9  ;;  %v415_v15 = vld [vmem:[%s634_s1 + $0xa0] sm:$0xf0]  ;;  %223 = vmatpush.bf16.msra.mxu1 %v390_v7  ;;  %v378_v16 = vor.u32 %v413_v11, %v375_v13  ;;  %v361_v18 = vld [vmem:[%s634_s1 + $0x78] sm:$0xf]  ;;  %v410_v20 = vld [vmem:[%s634_s1 + $0x7c] sm:$0xf] }
   0xa   :  { %237 = vmatpush.bf16.msra.mxu2 %v394_v8  ;;  %v382_v17 = vor.u32 %v415_v15, %v381_v14  ;;  %v411_v19 = vld [vmem:[%s634_s1 + $0x80] sm:$0xf0]  ;;  %v363_v21 = vld [vmem:[%s634_s1 + $0x84] sm:$0xf0]  ;;  %v369_v22 = vld [vmem:[%s634_s1 + $0x80] sm:$0xf] }
   0xb   :  { %v412_v23 = vld [vmem:[%s634_s1 + $0x88] sm:$0xf0]  ;;  %v362_v24 = vor.u32 %v411_v19, %v361_v18  ;;  %v366_v25 = vor.u32 %v410_v20, %v363_v21  ;;  %v349_v27 = vld [vmem:[%s634_s1 + $0x60] sm:$0xf]  ;;  %v407_v29 = vld [vmem:[%s634_s1 + $0x64] sm:$0xf] }
   0xc   :  { %210 = vmatpush.bf16.msra.mxu0 %v374_v12  ;;  %v370_v26 = vor.u32 %v412_v23, %v369_v22  ;;  %v408_v28 = vld [vmem:[%s634_s1 + $0x68] sm:$0xf0]  ;;  %v351_v30 = vld [vmem:[%s634_s1 + $0x6c] sm:$0xf0]  ;;  %v357_v31 = vld [vmem:[%s634_s1 + $0x68] sm:$0xf] }
   0xd   :  { %224 = vmatpush.bf16.msra.mxu1 %v378_v16  ;;  %v409_v32 = vld [vmem:[%s634_s1 + $0x70] sm:$0xf0]  ;;  %v350_v33 = vor.u32 %v408_v28, %v349_v27  ;;  %v354_v34 = vor.u32 %v407_v29, %v351_v30  ;;  %v337_v36 = vld [vmem:[%s634_s1 + $0x48] sm:$0xf]  ;;  %v404_v38 = vld [vmem:[%s634_s1 + $0x4c] sm:$0xf] }
   0xe   :  { %238 = vmatpush.bf16.msra.mxu2 %v382_v17  ;;  %v358_v35 = vor.u32 %v409_v32, %v357_v31  ;;  %v405_v37 = vld [vmem:[%s634_s1 + $0x50] sm:$0xf0]  ;;  %v339_v39 = vld [vmem:[%s634_s1 + $0x54] sm:$0xf0]  ;;  %v345_v40 = vld [vmem:[%s634_s1 + $0x50] sm:$0xf] }
   0xf   :  { %v406_v41 = vld [vmem:[%s634_s1 + $0x58] sm:$0xf0]  ;;  %v338_v42 = vor.u32 %v405_v37, %v337_v36  ;;  %v342_v43 = vor.u32 %v404_v38, %v339_v39  ;;  %v325_v45 = vld [vmem:[%s634_s1 + $0x30] sm:$0xf]  ;;  %v401_v47 = vld [vmem:[%s634_s1 + $0x34] sm:$0xf] }
  0x10   :  { %211 = vmatpush.bf16.msra.mxu0 %v362_v24  ;;  %v346_v44 = vor.u32 %v406_v41, %v345_v40  ;;  %v402_v46 = vld [vmem:[%s634_s1 + $0x38] sm:$0xf0]  ;;  %v327_v48 = vld [vmem:[%s634_s1 + $0x3c] sm:$0xf0]  ;;  %v333_v49 = vld [vmem:[%s634_s1 + $0x38] sm:$0xf] }
  0x11   :  { %225 = vmatpush.bf16.msra.mxu1 %v366_v25  ;;  %v403_v50 = vld [vmem:[%s634_s1 + $0x40] sm:$0xf0]  ;;  %v326_v51 = vor.u32 %v402_v46, %v325_v45  ;;  %v330_v52 = vor.u32 %v401_v47, %v327_v48  ;;  %v313_v54 = vld [vmem:[%s634_s1 + $0x18] sm:$0xf]  ;;  %v398_v56 = vld [vmem:[%s634_s1 + $0x1c] sm:$0xf] }
  0x12   :  { %239 = vmatpush.bf16.msra.mxu2 %v370_v26  ;;  %v334_v53 = vor.u32 %v403_v50, %v333_v49  ;;  %v399_v55 = vld [vmem:[%s634_s1 + $0x20] sm:$0xf0]  ;;  %v315_v57 = vld [vmem:[%s634_s1 + $0x24] sm:$0xf0]  ;;  %v321_v58 = vld [vmem:[%s634_s1 + $0x20] sm:$0xf] }
  0x13   :  { %v400_v59 = vld [vmem:[%s634_s1 + $0x28] sm:$0xf0]  ;;  %v314_v60 = vor.u32 %v399_v55, %v313_v54  ;;  %v318_v61 = vor.u32 %v398_v56, %v315_v57  ;;  %v301_v63 = vld [vmem:[%s634_s1] sm:$0xf]  ;;  %v395_v1 = vld [vmem:[%s634_s1 + $0x4] sm:$0xf] }
  0x14   :  { %212 = vmatpush.bf16.msra.mxu0 %v350_v33  ;;  %v322_v62 = vor.u32 %v400_v59, %v321_v58  ;;  %v396_v0 = vld [vmem:[%s634_s1 + $0x8] sm:$0xf0]  ;;  %v303_v2 = vld [vmem:[%s634_s1 + $0xc] sm:$0xf0]  ;;  %v309_v3 = vld [vmem:[%s634_s1 + $0x8] sm:$0xf] }
  0x15   :  { %226 = vmatpush.bf16.msra.mxu1 %v354_v34  ;;  %v397_v4 = vld [vmem:[%s634_s1 + $0x10] sm:$0xf0]  ;;  %v302_v5 = vor.u32 %v396_v0, %v301_v63  ;;  %v46_v6 = vld [vmem:[#allocation3] sm:$0xff]  ;;  %v47_v7 = vld [vmem:[#allocation3 + $0x8] sm:$0xff]  ;;  %v306_v8 = vor.u32 %v395_v1, %v303_v2 }
  0x16   :  { %240 = vmatpush.bf16.msra.mxu2 %v358_v35  ;;  %v310_v9 = vor.u32 %v397_v4, %v309_v3  ;;  %v48_v10 = vpack.c.bf16 %v47_v7, %v46_v6  ;;  %v272_v11 = vld [vmem:[%s635_s2] sm:$0x7] }
  0x17   :  { %v274_v12 = vperm.slane %v272_v11, 0  ;;  %v275_v13 = vperm.slane %v272_v11, 1  ;;  %v276_v19 = vperm.slane %v272_v11, 2 }
  0x18   :  { %213 = vmatpush.bf16.msra.mxu0 %v338_v42 }
  0x19   :  { %227 = vmatpush.bf16.msra.mxu1 %v342_v43 }
  0x1a   :  { %241 = vmatpush.bf16.msra.mxu2 %v346_v44 }
  0x1c   :  { %214 = vmatpush.bf16.msra.mxu0 %v326_v51 }
  0x1d   :  { %228 = vmatpush.bf16.msra.mxu1 %v330_v52 }
  0x1e   :  { %242 = vmatpush.bf16.msra.mxu2 %v334_v53 }
  0x20   :  { %215 = vmatpush.bf16.msra.mxu0 %v314_v60 }
  0x21   :  { %229 = vmatpush.bf16.msra.mxu1 %v318_v61 }
  0x22   :  { %243 = vmatpush.bf16.msra.mxu2 %v322_v62 }
  0x24   :  { %216 = vmatpush.bf16.msra.mxu0 %v302_v5 }
  0x25   :  { %230 = vmatpush.bf16.msra.mxu1 %v306_v8 }
  0x26   :  { %244 = vmatpush.bf16.msra.mxu2 %v310_v9 }
  0x27   :  { %217 = vmatmul.bf16.vlgmr.msra.gmra.mxu0 %v48_v10 }
  0x28   :  { %231 = vmatmul.bf16.vlgmr.msra.gmra.mxu1 %v48_v10 }
  0x29   :  { %245 = vmatmul.bf16.vlgmr.msra.gmra.mxu2 %v48_v10 }
  0xa4   :  { %v218_v14 = vpop.f32.mrf.mxu0 }
  0xa5   :  { %v280_v15 = vadd.f32 %v274_v12, %v218_v14  ;;  %v232_v16 = vpop.f32.mrf.mxu1 }
  0xa6   :  { %v281_v17 = vadd.f32 %v275_v13, %v232_v16 }
  0xa8   :  { %v286_v18 = vpack.c.bf16 %v281_v17, %v280_v15 }
  0xaa   :  { %290 = vst [vmem:[%s636_s3] sm:$0xff] %v286_v18 }
  0xac   :  { %v246_v20 = vpop.f32.mrf.mxu2  ;;  %v220_v22 = vpop.f32.mrf.mxu0 }
  0xad   :  { %v282_v21 = vadd.f32 %v276_v19, %v246_v20  ;;  %v283_v23 = vadd.f32 %v274_v12, %v220_v22  ;;  %v234_v24 = vpop.f32.mrf.mxu1 }
  0xae   :  { %v284_v26 = vadd.f32 %v275_v13, %v234_v24 }
  0xaf   :  { %v287_v25 = vpack.c.bf16 %v282_v21, %v282_v21 }
  0xb0   :  { %v288_v27 = vpack.c.bf16 %v284_v26, %v283_v23 }
  0xb1   :  { %291 = vst [vmem:[%s636_s3 + $0x8] sm:$0xf] %v287_v25 }
  0xb2   :  { %292 = vst [vmem:[%s636_s3 + $0xc] sm:$0xff] %v288_v27 }
  0xb4   :  { %v248_v28 = vpop.f32.mrf.mxu2 }
  0xb5   :  { %v285_v29 = vadd.f32 %v276_v19, %v248_v28 }
  0xb7   :  { %v289_v30 = vpack.c.bf16 %v285_v29, %v285_v29 }
  0xb9   :  { %293 = vst [vmem:[%s636_s3 + $0x14] sm:$0xf] %v289_v30 }
  0xba   :  { %298 = vsyncpa [#allocation4], 1 }

// kernel: decoder_layer.9
= control target key start
LH: loop header
LB: loop body
LE: loop exit
PB: predicated region body
PF: predicated region fallthrough
CT: control target
= control target key end

     0   :  { %8 = vsyncpa [#allocation4], 0  ;;  %s434_s0 = inlined_call_operand.hbm [shape: f32[16,128], index: 0, kind: input, shape index: {}]   ;;  %s435_s1 = inlined_call_operand.hbm [shape: bf16[128,256], index: 1, kind: input, shape index: {}]   ;;  %s436_s2 = inlined_call_operand.hbm [shape: f32[1,256], index: 2, kind: input, shape index: {}]   ;;  %s437_s3 = inlined_call_operand.vmem [shape: bf16[16,256], index: 3, kind: output, shape index: {}]  }
   0x1   :  { %9 = vsyncpa [#allocation6], 0  ;;  %s27_s14 = sshll.u32 %s435_s1, 4  ;;  %s394_s15 = smov [#allocation5]   ;;  %s28_s14 = int_to_ptr.hbm [resolvable:$true] %s27_s14 }
   0x2   :  { %s29_s16 = sshll.u32 %s394_s15, 4  ;;  %s14_s19 = sshll.u32 %s434_s0, 4  ;;  %s30_s16 = int_to_ptr.vmem [resolvable:$true] %s29_s16  ;;  %s15_s19 = int_to_ptr.hbm [resolvable:$true] %s14_s19 }
   0x3   :  { %s395_s20 = smov 128   ;;  %s396_s21 = smov 8  }
   0x4   :  { %35 = dma.hbm_to_vmem [thread:$0]  %s28_s14, 2048, %s30_s16, [#allocation6], %s395_s20, %s395_s20, %s396_s21  }
   0x5   :  { %s397_s22 = smov [#allocation3]   ;;  %s41_s26 = sshll.u32 %s436_s2, 4  ;;  %s42_s26 = int_to_ptr.hbm [resolvable:$true] %s41_s26 }
   0x6   :  { %s16_s23 = sshll.u32 %s397_s22, 4  ;;  %s398_s1 = smov [#allocation7]   ;;  %s17_s23 = int_to_ptr.vmem [resolvable:$true] %s16_s23 }
   0x7   :  { %22 = dma.hbm_to_vmem [thread:$0]  %s15_s19, 256, %s17_s23, [#allocation4], %s395_s20, %s395_s20, %s396_s21  }
   0x8   :  { %s43_s27 = sshll.u32 %s398_s1, 4  ;;  %s44_s27 = int_to_ptr.vmem [resolvable:$true] %s43_s27 }
   0x9   :  { %46 = dma.hbm_to_vmem [thread:$0]  %s42_s26, 32, %s44_s27, [#allocation6]  }
   0xa   :  { %390 = dma.done.wait [#allocation4], 256  }
   0xb   :  { %391 = vsyncadd [#allocation4], 4294967040 }
   0xc   :  { %392 = dma.done.wait [#allocation6], 2080  }
   0xd   :  { %393 = vsyncadd [#allocation6], 4294965216  ;;  %v291_v0 = vld [vmem:[#allocation5 + $0x70] sm:$0xf]  ;;  %v312_v1 = vld [vmem:[#allocation5 + $0x74] sm:$0xf0] }
   0xe   :  { %v311_v2 = vld [vmem:[#allocation5 + $0x74] sm:$0xf]  ;;  %v292_v3 = vor.u32 %v312_v1, %v291_v0  ;;  %v293_v4 = vld [vmem:[#allocation5 + $0x78] sm:$0xf0]  ;;  %v283_v5 = vld [vmem:[#allocation5 + $0x60] sm:$0xf] }
   0xf   :  { %v310_v6 = vld [vmem:[#allocation5 + $0x64] sm:$0xf0]  ;;  %v296_v7 = vor.u32 %v311_v2, %v293_v4  ;;  %v309_v8 = vld [vmem:[#allocation5 + $0x64] sm:$0xf]  ;;  %v285_v9 = vld [vmem:[#allocation5 + $0x68] sm:$0xf0] }
  0x10   :  { %170 = vmatpush.bf16.msra.mxu0 %v292_v3  ;;  %v284_v10 = vor.u32 %v310_v6, %v283_v5  ;;  %v288_v11 = vor.u32 %v309_v8, %v285_v9  ;;  %v275_v12 = vld [vmem:[#allocation5 + $0x50] sm:$0xf]  ;;  %v308_v13 = vld [vmem:[#allocation5 + $0x54] sm:$0xf0]  ;;  %v307_v14 = vld [vmem:[#allocation5 + $0x54] sm:$0xf] }
  0x11   :  { %184 = vmatpush.bf16.msra.mxu1 %v296_v7  ;;  %v277_v15 = vld [vmem:[#allocation5 + $0x58] sm:$0xf0]  ;;  %v276_v16 = vor.u32 %v308_v13, %v275_v12  ;;  %v267_v18 = vld [vmem:[#allocation5 + $0x40] sm:$0xf]  ;;  %v306_v19 = vld [vmem:[#allocation5 + $0x44] sm:$0xf0] }
  0x12   :  { %v280_v17 = vor.u32 %v307_v14, %v277_v15  ;;  %v305_v20 = vld [vmem:[#allocation5 + $0x44] sm:$0xf]  ;;  %v269_v21 = vld [vmem:[#allocation5 + $0x48] sm:$0xf0]  ;;  %v268_v22 = vor.u32 %v306_v19, %v267_v18  ;;  %v259_v24 = vld [vmem:[#allocation5 + $0x30] sm:$0xf] }
  0x13   :  { %v272_v23 = vor.u32 %v305_v20, %v269_v21  ;;  %v304_v25 = vld [vmem:[#allocation5 + $0x34] sm:$0xf0]  ;;  %v303_v26 = vld [vmem:[#allocation5 + $0x34] sm:$0xf]  ;;  %v261_v27 = vld [vmem:[#allocation5 + $0x38] sm:$0xf0] }
  0x14   :  { %171 = vmatpush.bf16.msra.mxu0 %v284_v10  ;;  %v260_v28 = vor.u32 %v304_v25, %v259_v24  ;;  %v264_v29 = vor.u32 %v303_v26, %v261_v27  ;;  %v251_v30 = vld [vmem:[#allocation5 + $0x20] sm:$0xf]  ;;  %v302_v31 = vld [vmem:[#allocation5 + $0x24] sm:$0xf0]  ;;  %v301_v32 = vld [vmem:[#allocation5 + $0x24] sm:$0xf] }
  0x15   :  { %185 = vmatpush.bf16.msra.mxu1 %v288_v11  ;;  %v253_v33 = vld [vmem:[#allocation5 + $0x28] sm:$0xf0]  ;;  %v252_v34 = vor.u32 %v302_v31, %v251_v30  ;;  %v243_v36 = vld [vmem:[#allocation5 + $0x10] sm:$0xf]  ;;  %v300_v37 = vld [vmem:[#allocation5 + $0x14] sm:$0xf0] }
  0x16   :  { %v256_v35 = vor.u32 %v301_v32, %v253_v33  ;;  %v299_v38 = vld [vmem:[#allocation5 + $0x14] sm:$0xf]  ;;  %v245_v39 = vld [vmem:[#allocation5 + $0x18] sm:$0xf0]  ;;  %v244_v40 = vor.u32 %v300_v37, %v243_v36  ;;  %v235_v42 = vld [vmem:[#allocation5] sm:$0xf] }
  0x17   :  { %v248_v41 = vor.u32 %v299_v38, %v245_v39  ;;  %v298_v43 = vld [vmem:[#allocation5 + $0x4] sm:$0xf0]  ;;  %v297_v44 = vld [vmem:[#allocation5 + $0x4] sm:$0xf]  ;;  %v237_v45 = vld [vmem:[#allocation5 + $0x8] sm:$0xf0] }
  0x18   :  { %172 = vmatpush.bf16.msra.mxu0 %v276_v16  ;;  %v236_v46 = vor.u32 %v298_v43, %v235_v42  ;;  %v71_v47 = vld [vmem:[#allocation3] sm:$0xff]  ;;  %v72_v48 = vld [vmem:[#allocation3 + $0x8] sm:$0xff]  ;;  %v240_v49 = vor.u32 %v297_v44, %v237_v45  ;;  %v213_v51 = vld [vmem:[#allocation7] sm:$0x3] }
  0x19   :  { %186 = vmatpush.bf16.msra.mxu1 %v280_v17  ;;  %v73_v50 = vpack.c.bf16 %v72_v48, %v71_v47  ;;  %v215_v52 = vperm.slane %v213_v51, 0  ;;  %v216_v53 = vperm.slane %v213_v51, 1 }
  0x1c   :  { %173 = vmatpush.bf16.msra.mxu0 %v268_v22 }
  0x1d   :  { %187 = vmatpush.bf16.msra.mxu1 %v272_v23 }
  0x20   :  { %174 = vmatpush.bf16.msra.mxu0 %v260_v28 }
  0x21   :  { %188 = vmatpush.bf16.msra.mxu1 %v264_v29 }
  0x24   :  { %175 = vmatpush.bf16.msra.mxu0 %v252_v34 }
  0x25   :  { %189 = vmatpush.bf16.msra.mxu1 %v256_v35 }
  0x28   :  { %176 = vmatpush.bf16.msra.mxu0 %v244_v40 }
  0x29   :  { %190 = vmatpush.bf16.msra.mxu1 %v248_v41 }
  0x2c   :  { %177 = vmatpush.bf16.msra.mxu0 %v236_v46 }
  0x2d   :  { %191 = vmatpush.bf16.msra.mxu1 %v240_v49 }
  0x2f   :  { %178 = vmatmul.bf16.vlgmr.msra.gmra.mxu0 %v73_v50 }
  0x30   :  { %192 = vmatmul.bf16.vlgmr.msra.gmra.mxu1 %v73_v50 }
  0xac   :  { %v179_v54 = vpop.f32.mrf.mxu0 }
  0xad   :  { %v219_v55 = vadd.f32 %v215_v52, %v179_v54  ;;  %v193_v56 = vpop.f32.mrf.mxu1 }
  0xae   :  { %v220_v57 = vadd.f32 %v216_v53, %v193_v56 }
  0xb0   :  { %v223_v58 = vpack.c.bf16 %v220_v57, %v219_v55 }
  0xb2   :  { %225 = vst [vmem:[%s437_s3] sm:$0xff] %v223_v58 }
  0xb4   :  { %v181_v59 = vpop.f32.mrf.mxu0 }
  0xb5   :  { %v221_v60 = vadd.f32 %v215_v52, %v181_v59  ;;  %v195_v61 = vpop.f32.mrf.mxu1 }
  0xb6   :  { %v222_v62 = vadd.f32 %v216_v53, %v195_v61 }
  0xb8   :  { %v224_v63 = vpack.c.bf16 %v222_v62, %v221_v60 }
  0xba   :  { %226 = vst [vmem:[%s437_s3 + $0x8] sm:$0xff] %v224_v63 }
  0xbb   :  { %231 = vsyncpa [#allocation4], 1 }
  0xbc   :  { %232 = vsyncpa [#allocation6], 1 }

// kernel: decoder_layer.8
= control target key start
LH: loop header
LB: loop body
LE: loop exit
PB: predicated region body
PF: predicated region fallthrough
CT: control target
= control target key end

     0   :  { %s228_s1 = inlined_call_operand.vmem [shape: bf16[128,128], index: 1, kind: input, shape index: {}]   ;;  %s229_s2 = inlined_call_operand.vmem [shape: f32[1,128], index: 2, kind: input, shape index: {}]   ;;  %s230_s0 = inlined_call_operand.vmem [shape: f32[16,128], index: 0, kind: input, shape index: {}]   ;;  %s231_s3 = inlined_call_operand.vmem [shape: bf16[16,128], index: 3, kind: output, shape index: {}]  }
   0x1   :  { %v165_v0 = vld [vmem:[%s228_s1 + $0x38] sm:$0xff]  ;;  %v164_v1 = vld [vmem:[%s228_s1 + $0x30] sm:$0xff]  ;;  %v163_v2 = vld [vmem:[%s228_s1 + $0x28] sm:$0xff] }
   0x2   :  { %89 = vmatpush.bf16.msra.mxu0 %v165_v0  ;;  %v162_v3 = vld [vmem:[%s228_s1 + $0x20] sm:$0xff]  ;;  %v161_v4 = vld [vmem:[%s228_s1 + $0x18] sm:$0xff]  ;;  %v160_v5 = vld [vmem:[%s228_s1 + $0x10] sm:$0xff] }
   0x3   :  { %v159_v6 = vld [vmem:[%s228_s1 + $0x8] sm:$0xff]  ;;  %v158_v7 = vld [vmem:[%s228_s1] sm:$0xff] }
   0x4   :  { %v22_v8 = vld [vmem:[%s230_s0] sm:$0xff]  ;;  %v23_v9 = vld [vmem:[%s230_s0 + $0x8] sm:$0xff] }
   0x5   :  { %v24_v10 = vpack.c.bf16 %v23_v9, %v22_v8  ;;  %v171_v12 = vld [vmem:[%s229_s2] ss:$0 sm:$0xff] }
   0x6   :  { %90 = vmatpush.bf16.msra.mxu0 %v164_v1 }
   0xa   :  { %91 = vmatpush.bf16.msra.mxu0 %v163_v2 }
   0xe   :  { %92 = vmatpush.bf16.msra.mxu0 %v162_v3 }
  0x12   :  { %93 = vmatpush.bf16.msra.mxu0 %v161_v4 }
  0x16   :  { %94 = vmatpush.bf16.msra.mxu0 %v160_v5 }
  0x1a   :  { %95 = vmatpush.bf16.msra.mxu0 %v159_v6 }
  0x1e   :  { %96 = vmatpush.bf16.msra.mxu0 %v158_v7 }
  0x21   :  { %97 = vmatmul.bf16.vlgmr.msra.gmra.mxu0 %v24_v10 }
  0x9e   :  { %v98_v11 = vpop.f32.mrf.mxu0 }
  0x9f   :  { %v116_v14 = vadd.f32 %v171_v12, %v98_v11 }
  0xa6   :  { %v100_v13 = vpop.f32.mrf.mxu0 }
  0xa7   :  { %v117_v15 = vadd.f32 %v171_v12, %v100_v13 }
  0xa9   :  { %v169_v16 = vpack.c.bf16 %v117_v15, %v116_v14 }
  0xab   :  { %170 = vst [vmem:[%s231_s3] sm:$0xff] %v169_v16  }

// kernel: decoder_layer.7
= control target key start
LH: loop header
LB: loop body
LE: loop exit
PB: predicated region body
PF: predicated region fallthrough
CT: control target
= control target key end

     0   :  { %s1048_s27 = smov 0   ;;  %s1149_s0 = inlined_call_operand.vmem [shape: bf16[2,8,384], index: 0, kind: input, shape index: {}, may-alias: {0,1,2}]   ;;  %s1150_s1 = inlined_call_operand.vmem [shape: bf16[2,8,384], index: 1, kind: input, shape index: {}, may-alias: {0,1,2}]   ;;  %s1151_s2 = inlined_call_operand.vmem [shape: bf16[2,8,384], index: 2, kind: input, shape index: {}, may-alias: {0,1,2}]   ;;  %s1152_s3 = inlined_call_operand.vmem [shape: f32[2,8,128], index: 3, kind: input, shape index: {}]   ;;  %s1153_s4 = inlined_call_operand.vmem [shape: bf16[128,128], index: 4, kind: input, shape index: {}]   ;;  %s1154_s5 = inlined_call_operand.vmem [shape: f32[1,128], index: 5, kind: input, shape index: {}]   ;;  %s1155_s6 = inlined_call_operand.vmem [shape: f32[1,128], index: 6, kind: input, shape index: {}]   ;;  %s1156_s7 = inlined_call_operand.vmem [shape: f32[1,128], index: 7, kind: input, shape index: {}]   ;;  %s1157_s8 = inlined_call_operand.vmem [shape: f32[2,8,128], index: 8, kind: output, shape index: {}]  }
   0x1 LB: > { %s887_s28 = sadd.s32 4294967295, %s996_s27   ;;  %p891_p0 = scmp.ge.s32.totalorder %s996_s27, 1  ;;  %s996_s27 = sphi %s1048_s27, %s18_s27  }
   0x2   : > { %p293_p1 = scmp.lt.s32.totalorder %s996_s27, 3 }
   0x4   : > { %p294_p2 = pnand %p891_p0, %p293_p1 }
   0x5   : > { %p342_p3 = scmp.lt.s32.totalorder (!%p294_p2), %s887_s28, 1  ;;  %s998_s14 = smov (!%p294_p2), 96  }
   0x6   : > { %297 = sbr.rel (%p294_p2) target bundleno = 1238 (0x4d6), region = 52  ;;  %s1000_s18 = smov (!%p294_p2), 32  }
   0x7   : > { %s1001_s19 = smov (!%p294_p2), 64  }
   0xb   : > { %s1159_s28 = smov (!%p342_p3, %s887_s28), 1  ;;  %vm377_vm0 = vcmask 261120   ;;  %v371_v12 = vlaneseq  ;;  %v999_v16 = vmov 0.0   ;;  %vm397_vm2 = vcmask 64512   ;;  %v946_v35 = vld [vmem:[%s1153_s4 + $0x8] sm:$0xff]  ;;  %v945_v36 = vld [vmem:[%s1153_s4] sm:$0xff] }
   0xc   : > { %s953_s29 = smul.u32 12, %s1159_s28  ;;  %vm412_vm3 = vcmask 1043456   ;;  %v948_v58 = vld [vmem:[%s1153_s4 + $0x18] sm:$0xff]  ;;  %v947_v59 = vld [vmem:[%s1153_s4 + $0x10] sm:$0xff]  ;;  %s895_s16 = sshll.u32 %s1159_s28, 3 }
   0xd   : > { %v372_v13 = vshrl.u32 %v371_v12, 7  ;;  %v374_v14 = vand.u32 127, %v371_v12  ;;  %s362_s21 = scalar_lea.vmem %s1152_s3, %s895_s16  ;;  %s366_s30 = scalar_lea.vmem %s1157_s8, %s895_s16 }
   0xe   : > { %s835_s10 = scalar_lea.vmem %s1150_s1, %s953_s29  ;;  %s346_s13 = scalar_lea.vmem %s1149_s0, %s953_s29 }
   0xf   : > { %v897_v0 = vld [vmem:[%s835_s10 + $0x4] sm:$0xf]  ;;  %v368_v3 = vld [vmem:[%s346_s13] sm:$0xf]  ;;  %s839_s17 = scalar_lea.vmem %s1151_s2, %s953_s29  ;;  %vm375_vm1 = vcmp.gt.s32.totalorder %v374_v14, %v372_v13 }
  0x10   : > { %v382_v1 = vsel %vm377_vm0, %v897_v0, 0  ;;  %v441_v2 = vunpack.c.l.b16 %v897_v0  ;;  %v436_v5 = vunpack.c.l.b16 %v368_v3  ;;  %v898_v7 = vld [vmem:[%s839_s17 + $0x8] sm:$0xf]  ;;  %v1072_v17 = vsel %vm375_vm1, -1e+09, %v999_v16 }
  0x11   : > { %391 = vmatpush.bf16.xpose.msra.mxu0 %v382_v1  ;;  %v476_v8 = vunpack.c.l.b16 %v898_v7  ;;  %v414_v22 = vsel %vm412_vm3, %v898_v7, 0 }
  0x12   : > { %v442_v4 = vpack.c.b16 %v441_v2, %v441_v2  ;;  %v437_v6 = vpack.c.b16 %v436_v5, %v436_v5  ;;  %423 = vmatpush.bf16.msra.mxu1 %v414_v22 }
  0x13   : > { %v477_v9 = vpack.c.b16 %v476_v8, %v476_v8 }
  0x14   : > { %443 = vrot.lane.b32.xlu0 %v442_v4, %s998_s14 }
  0x15   : > { %478 = vrot.lane.b32.xlu2 %v477_v9, %s998_s14 }
  0x16   : > { %526 = vmatpush.bf16.msrb.mxu1 %v948_v58 }
  0x18   : > { %899 = vmatmul.msk.bf16.vlgmr.msra.gmra.mxu0 %vm377_vm0, %v368_v3 }
  0x1a   : > { %527 = vmatpush.bf16.msrb.mxu1 %v947_v59 }
  0x1c   : > { %438 = vrot.lane.b32.xlu0 %v437_v6, %s998_s14 }
  0x24   : > { %653 = vrot.lane.b32.xlu0 %v442_v4, %s1000_s18 }
  0x2c   : > { %651 = vrot.lane.b32.xlu0 %v437_v6, %s1000_s18 }
  0x34   : > { %561 = vrot.lane.b32.xlu0 %v437_v6, %s1001_s19 }
  0x6f   : > { %v479_v26 = vpop.permute.xlu2 %478 }
  0x70   : > { %v484_v27 = vsel %vm412_vm3, %v479_v26, 0 }
  0x71   : > { %493 = vmatpush.bf16.msra.mxu3 %v484_v27  ;;  %v950_v27 = vld [vmem:[%s1153_s4 + $0x28] sm:$0xff] }
  0x75   : > { %554 = vmatpush.bf16.msrb.mxu3 %v946_v35 }
  0x79   : > { %555 = vmatpush.bf16.msrb.mxu3 %v945_v36 }
  0x86   : > { %v444_v10 = vpop.permute.xlu0 %443 }
  0x87   : > { %v449_v11 = vsel %vm377_vm0, %v444_v10, 0 }
  0x88   : > { %458 = vmatpush.bf16.xpose.msra.mxu2 %v449_v11 }
  0x8e   : > { %v439_v15 = vpop.permute.xlu0 %438 }
  0x8f   : > { %901 = vmatmul.msk.bf16.vlgmr.msra.gmra.mxu2 %vm377_vm0, %v439_v15 }
  0x95   : > { %v393_v18 = vpop.f32.mrf.mxu0 }
  0x96   : > { %v394_v19 = vadd.f32 %v393_v18, %v1072_v17  ;;  %v654_v41 = vpop.permute.xlu0 %653 }
  0x97   : > { %v659_v45 = vsel %vm377_vm0, %v654_v41, 0 }
  0x98   : > { %v398_v20 = vsel %vm397_vm2, %v394_v19, -inf }
  0x99   : > { %399 = vmax.xlane.f32.xlu1 %v398_v20 }
  0x9d   : > { %v395_v21 = vpop.f32.mrf.mxu0 }
  0x9e   : > { %v652_v48 = vpop.permute.xlu0 %651 }
  0xa6   : > { %v562_v57 = vpop.permute.xlu0 %561 }
 0x10c   : > { %v400_v23 = vpop.xlane.xlu1 %399 }
 0x10d   : > { %v401_v24 = vsub.f32 %v394_v19, %v400_v23 }
 0x10f   : > { %v402_v25 = vmul.f32 1.442695, %v401_v24 }
 0x111   : > { %970 = vpow2.f32 %v402_v25 }
 0x112   : > { %v460_v28 = vpop.f32.mrf.mxu2 }
 0x113   : > { %v461_v29 = vadd.f32 %v460_v28, %v1072_v17  ;;  %v949_v28 = vld [vmem:[%s1153_s4 + $0x20] sm:$0xff] }
 0x115   : > { %v464_v30 = vsel %vm397_vm2, %v461_v29, -inf }
 0x116   : > { %465 = vmax.xlane.f32.xlu1 %v464_v30  ;;  %v951_v30 = vld [vmem:[%s1153_s4 + $0x30] sm:$0xff] }
 0x117   : > { %v971_v31 = vpop.eup %970 }
 0x118   : > { %v404_v32 = vsel %vm397_vm2, %v971_v31, 0.0  ;;  %v408_v33 = vpack.c.bf16 %v971_v31, %v971_v31 }
 0x119   : > { %405 = vadd.xlane.f32.xlu2 %v404_v32 }
 0x11a   : > { %900 = vmatmul.msk.bf16.vlgmr.msra.gmra.mxu1 %vm397_vm2, %v408_v33  ;;  %v462_v34 = vpop.f32.mrf.mxu2 }
 0x11b   : > { %643 = vmatpush.bf16.msra.mxu1 %v950_v27 }
 0x11f   : > { %644 = vmatpush.bf16.msra.mxu1 %v949_v28 }
 0x12f   : > { %563 = vrot.lane.b32.xlu1 %v442_v4, %s1001_s19 }
 0x131   : > { %595 = vrot.lane.b32.xlu2 %v477_v9, %s1001_s19 }
 0x139   : > { %685 = vrot.lane.b32.xlu2 %v477_v9, %s1000_s18 }
 0x189   : > { %v466_v37 = vpop.xlane.xlu1 %465 }
 0x18a   : > { %v467_v38 = vsub.f32 %v461_v29, %v466_v37  ;;  %v952_v29 = vld [vmem:[%s1153_s4 + $0x38] sm:$0xff] }
 0x18c   : > { %v468_v39 = vmul.f32 1.442695, %v467_v38  ;;  %v406_v40 = vpop.xlane.xlu2 %405 }
 0x18e   : > { %972 = vpow2.f32 %v468_v39 }
 0x18f   : > { %974 = vrcp.f32 %v406_v40 }
 0x194   : > { %v973_v42 = vpop.eup %972  ;;  %v596_v47 = vpop.permute.xlu2 %595 }
 0x195   : > { %v470_v43 = vsel %vm397_vm2, %v973_v42, 0.0  ;;  %v474_v44 = vpack.c.bf16 %v973_v42, %v973_v42  ;;  %v975_v50 = vpop.eup %974  ;;  %v601_v12 = vsel %vm412_vm3, %v596_v47, 0  ;;  %v967_v47 = vld [vmem:[%s1154_s5] ss:$0 sm:$0xff] }
 0x196   : > { %471 = vadd.xlane.f32.xlu2 %v470_v43  ;;  %610 = vmatpush.bf16.msrb.mxu2 %v601_v12  ;;  %v969_v12 = vld [vmem:[%s1156_s7] ss:$0 sm:$0xff] }
 0x197   : > { %v425_v46 = vpop.f32.mrf.mxu1  ;;  %902 = vmatmul.msk.bf16.vlgmr.msra.gmra.mxu3 %vm397_vm2, %v474_v44 }
 0x198   : > { %668 = vmatpush.bf16.xpose.msra.mxu3 %v659_v45  ;;  %v429_v52 = vmul.f32 %v975_v50, %v425_v46  ;;  %v746_v50 = vld [vmem:[%s362_s21] sm:$0xff] }
 0x19a   : > { %v430_v56 = vpack.c.bf16 %v429_v52, %v429_v52  ;;  %733 = vmatpush.bf16.msra.mxu2 %v952_v29 }
 0x19c   : > { %v686_v51 = vpop.permute.xlu2 %685 }
 0x19d   : > { %v691_v54 = vsel %vm412_vm3, %v686_v51, 0 }
 0x19e   : > { %734 = vmatpush.bf16.msra.mxu2 %v951_v30 }
 0x19f   : > { %v427_v49 = vpop.f32.mrf.mxu1 }
 0x1a1   : > { %v564_v53 = vpop.permute.xlu1 %563 }
 0x1a2   : > { %v569_v55 = vsel %vm377_vm0, %v564_v53, 0 }
 0x1a3   : > { %578 = vmatpush.bf16.xpose.msrb.mxu0 %v569_v55 }
 0x1a7   : > { %920 = vmatmul.msk.bf16.vlgmr.msrb.gmra.mxu3 %vm377_vm0, %v430_v56 }
 0x1aa   : > { %921 = vmatmul.msk.bf16.vlgmr.msrb.gmra.mxu0 %vm377_vm0, %v562_v57 }
 0x1ab   : > { %700 = vmatpush.bf16.msra.mxu0 %v691_v54  ;;  %v1002_v54 = vmov 128.0  }
 0x1b7   : > { %932 = vmatmul.msk.bf16.vlgmr.msra.gmra.mxu3 %vm377_vm0, %v652_v48 }
 0x209   : > { %v472_v60 = vpop.xlane.xlu2 %471 }
 0x20a   : > { %976 = vrcp.f32 %v472_v60 }
 0x210   : > { %v977_v61 = vpop.eup %976 }
 0x21a   : > { %v495_v62 = vpop.f32.mrf.mxu3 }
 0x21b   : > { %v499_v63 = vmul.f32 %v977_v61, %v495_v62 }
 0x21d   : > { %v500_v0 = vpack.c.bf16 %v499_v63, %v499_v63 }
 0x21f   : > { %911 = vmatmul.msk.bf16.vlgmr.msrb.gmra.mxu1 %vm377_vm0, %v500_v0 }
 0x222   : > { %v497_v1 = vpop.f32.mrf.mxu3 }
 0x227   : > { %v580_v2 = vpop.f32.mrf.mxu0 }
 0x228   : > { %v581_v3 = vadd.f32 %v580_v2, %v1072_v17 }
 0x22a   : > { %v557_v4 = vpop.f32.mrf.mxu3  ;;  %v584_v5 = vsel %vm397_vm2, %v581_v3, -inf }
 0x22b   : > { %585 = vmax.xlane.f32.xlu0 %v584_v5 }
 0x22f   : > { %v582_v6 = vpop.f32.mrf.mxu0 }
 0x232   : > { %v559_v7 = vpop.f32.mrf.mxu3 }
 0x23a   : > { %v670_v8 = vpop.f32.mrf.mxu3 }
 0x23b   : > { %v671_v9 = vadd.f32 %v670_v8, %v1072_v17 }
 0x23d   : > { %v674_v10 = vsel %vm397_vm2, %v671_v9, -inf }
 0x23e   : > { %675 = vmax.xlane.f32.xlu1 %v674_v10  ;;  %v968_v10 = vld [vmem:[%s1155_s6] ss:$0 sm:$0xff] }
 0x242   : > { %v672_v11 = vpop.f32.mrf.mxu3 }
 0x29c   : > { %v529_v13 = vpop.f32.mrf.mxu1 }
 0x29d   : > { %v558_v45 = vadd.f32 %v557_v4, %v529_v13 }
 0x29e   : > { %v586_v14 = vpop.xlane.xlu0 %585 }
 0x29f   : > { %v587_v15 = vsub.f32 %v581_v3, %v586_v14 }
 0x2a1   : > { %v588_v16 = vmul.f32 1.442695, %v587_v15 }
 0x2a3   : > { %978 = vpow2.f32 %v588_v16 }
 0x2a4   : > { %v531_v18 = vpop.f32.mrf.mxu1 }
 0x2a9   : > { %v979_v19 = vpop.eup %978 }
 0x2aa   : > { %v590_v20 = vsel %vm397_vm2, %v979_v19, 0.0  ;;  %v594_v21 = vpack.c.bf16 %v979_v19, %v979_v19 }
 0x2ab   : > { %591 = vadd.xlane.f32.xlu1 %v590_v20 }
 0x2ac   : > { %922 = vmatmul.msk.bf16.vlgmr.msrb.gmra.mxu2 %vm397_vm2, %v594_v21 }
 0x2b1   : > { %v676_v17 = vpop.xlane.xlu1 %675 }
 0x2b2   : > { %v677_v22 = vsub.f32 %v671_v9, %v676_v17 }
 0x2b4   : > { %v678_v23 = vmul.f32 1.442695, %v677_v22 }
 0x2b6   : > { %980 = vpow2.f32 %v678_v23 }
 0x2bc   : > { %v981_v24 = vpop.eup %980 }
 0x2bd   : > { %v684_v25 = vpack.c.bf16 %v981_v24, %v981_v24  ;;  %v680_v26 = vsel %vm397_vm2, %v981_v24, 0.0 }
 0x2be   : > { %681 = vadd.xlane.f32.xlu0 %v680_v26 }
 0x2bf   : > { %933 = vmatmul.msk.bf16.vlgmr.msra.gmra.mxu0 %vm397_vm2, %v684_v25 }
 0x31e   : > { %v592_v31 = vpop.xlane.xlu1 %591 }
 0x31f   : > { %982 = vrcp.f32 %v592_v31 }
 0x325   : > { %v983_v32 = vpop.eup %982 }
 0x32f   : > { %v612_v33 = vpop.f32.mrf.mxu2 }
 0x330   : > { %v616_v34 = vmul.f32 %v983_v32, %v612_v33 }
 0x331   : > { %v682_v36 = vpop.xlane.xlu0 %681 }
 0x332   : > { %v617_v35 = vpack.c.bf16 %v616_v34, %v616_v34  ;;  %984 = vrcp.f32 %v682_v36 }
 0x333   : > { %986 = vrcp.f32 %v1002_v54 }
 0x334   : > { %931 = vmatmul.msk.bf16.vlgmr.msra.gmra.mxu1 %vm377_vm0, %v617_v35 }
 0x337   : > { %v614_v37 = vpop.f32.mrf.mxu2 }
 0x338   : > { %v985_v38 = vpop.eup %984 }
 0x339   : > { %v987_v55 = vpop.eup %986 }
 0x33a   : > { %v751_v56 = vmul.f32 128.0, %v987_v55  ;;  %vm755_vm4 = vweird.f32 %v987_v55 }
 0x33c   : > { %v702_v39 = vpop.f32.mrf.mxu0  ;;  %v752_v57 = vsub.f32 1.0, %v751_v56 }
 0x33d   : > { %v706_v40 = vmul.f32 %v985_v38, %v702_v39 }
 0x33e   : > { %v753_v58 = vmul.f32 %v987_v55, %v752_v57 }
 0x33f   : > { %v707_v41 = vpack.c.bf16 %v706_v40, %v706_v40 }
 0x340   : > { %v754_v59 = vadd.f32 %v987_v55, %v753_v58 }
 0x341   : > { %942 = vmatmul.msk.bf16.vlgmr.msra.gmra.mxu2 %vm377_vm0, %v707_v41 }
 0x342   : > { %v756_v60 = vsel %vm755_vm4, %v987_v55, %v754_v59 }
 0x344   : > { %v704_v42 = vpop.f32.mrf.mxu0 }
 0x3b1   : > { %v646_v43 = vpop.f32.mrf.mxu1 }
 0x3b2   : > { %v650_v46 = vadd.f32 %v646_v43, %v558_v45 }
 0x3b9   : > { %v648_v44 = vpop.f32.mrf.mxu1 }
 0x3c4   : > { %v736_v48 = vpop.f32.mrf.mxu2 }
 0x3c5   : > { %v740_v49 = vadd.f32 %v736_v48, %v650_v46 }
 0x3c7   : > { %v745_v51 = vadd.f32 %v967_v47, %v740_v49 }
 0x3c9   : > { %v747_v52 = vadd.f32 %v746_v50, %v745_v51 }
 0x3cb   : > { %748 = vadd.xlane.f32.xlu0 %v747_v52 }
 0x3cc   : > { %v738_v53 = vpop.f32.mrf.mxu2 }
 0x43e   : > { %v749_v61 = vpop.xlane.xlu0 %748 }
 0x43f   : > { %v757_v62 = vmul.f32 %v756_v60, %v749_v61 }
 0x441   : > { %v758_v63 = vsub.f32 %v747_v52, %v757_v62 }
 0x443   : > { %v759_v0 = vmul.f32 %v758_v63, %v758_v63 }
 0x445   : > { %760 = vadd.xlane.f32.xlu1 %v759_v0 }
 0x4b8   : > { %v761_v1 = vpop.xlane.xlu1 %760 }
 0x4b9   : > { %v762_v2 = vmul.f32 %v761_v1, %v756_v60 }
 0x4bb   : > { %v763_v3 = vadd.f32 1e-05, %v762_v2 }
 0x4bd   : > { %988 = vrsqrt.f32 %v763_v3  ;;  %vm770_vm6 = vweird.f32 %v763_v3 }
 0x4c3   : > { %v989_v4 = vpop.eup %988 }
 0x4c4   : > { %v765_v5 = vmul.f32 %v989_v4, %v763_v3  ;;  %vm771_vm5 = vweird.f32 %v989_v4 }
 0x4c5   : > { %vm772_vm7 = vmor %vm770_vm6, %vm771_vm5 }
 0x4c6   : > { %v766_v6 = vmul.f32 %v989_v4, %v765_v5 }
 0x4c8   : > { %v767_v7 = vmul.f32 0.5, %v766_v6 }
 0x4ca   : > { %v768_v8 = vsub.f32 1.5, %v767_v7 }
 0x4cc   : > { %v769_v9 = vmul.f32 %v989_v4, %v768_v8 }
 0x4ce   : > { %v773_v11 = vsel %vm772_vm7, %v989_v4, %v769_v9 }
 0x4cf   : > { %v774_v13 = vmul.f32 %v773_v11, %v758_v63 }
 0x4d1   : > { %v779_v14 = vmul.f32 %v968_v10, %v774_v13 }
 0x4d3   : > { %v784_v15 = vadd.f32 %v969_v12, %v779_v14 }
 0x4d5   : > { %785 = vst [vmem:[%s366_s30] sm:$0xff] %v784_v15 }
 0x4d6 PF: > { %s18_s27 = sadd.s32 1, %s996_s27  }
 0x4d7   : > { %p15_p4 = scmp.ge.s32.totalorder %s18_s27, 4  }
 0x4d9   :  { %17 = sbr.rel (!%p15_p4) target bundleno = 1 (0x1), region = 91 }

// kernel: decoder_layer.11
= control target key start
LH: loop header
LB: loop body
LE: loop exit
PB: predicated region body
PF: predicated region fallthrough
CT: control target
= control target key end

     0   :  { %s836_s0 = inlined_call_operand.vmem [shape: f32[16,128], index: 0, kind: input, shape index: {}]   ;;  %s837_s1 = inlined_call_operand.vmem [shape: bf16[128,256], index: 1, kind: input, shape index: {}]   ;;  %s838_s2 = inlined_call_operand.vmem [shape: f32[1,256], index: 2, kind: input, shape index: {}]   ;;  %s839_s3 = inlined_call_operand.vmem [shape: bf16[256,128], index: 3, kind: input, shape index: {}]   ;;  %s840_s4 = inlined_call_operand.vmem [shape: f32[1,128], index: 4, kind: input, shape index: {}]   ;;  %s841_s5 = inlined_call_operand.vmem [shape: f32[1,128], index: 5, kind: input, shape index: {}]   ;;  %s842_s6 = inlined_call_operand.vmem [shape: f32[1,128], index: 6, kind: input, shape index: {}]   ;;  %s843_s7 = inlined_call_operand.hbm [shape: f32[16,128], index: 7, kind: output, shape index: {}]  }
   0x1   :  { %v486_v0 = vld [vmem:[%s837_s1 + $0x70] sm:$0xf]  ;;  %v571_v1 = vld [vmem:[%s837_s1 + $0x74] sm:$0xf0]  ;;  %v570_v2 = vld [vmem:[%s837_s1 + $0x74] sm:$0xf] }
   0x2   :  { %v487_v3 = vor.u32 %v571_v1, %v486_v0  ;;  %v488_v4 = vld [vmem:[%s837_s1 + $0x78] sm:$0xf0]  ;;  %v478_v5 = vld [vmem:[%s837_s1 + $0x60] sm:$0xf]  ;;  %v569_v6 = vld [vmem:[%s837_s1 + $0x64] sm:$0xf0] }
   0x3   :  { %v491_v7 = vor.u32 %v570_v2, %v488_v4  ;;  %v568_v8 = vld [vmem:[%s837_s1 + $0x64] sm:$0xf]  ;;  %v480_v9 = vld [vmem:[%s837_s1 + $0x68] sm:$0xf0]  ;;  %v479_v10 = vor.u32 %v569_v6, %v478_v5  ;;  %v470_v12 = vld [vmem:[%s837_s1 + $0x50] sm:$0xf] }
   0x4   :  { %138 = vmatpush.bf16.msra.mxu0 %v487_v3  ;;  %v483_v11 = vor.u32 %v568_v8, %v480_v9  ;;  %v567_v13 = vld [vmem:[%s837_s1 + $0x54] sm:$0xf0]  ;;  %v566_v14 = vld [vmem:[%s837_s1 + $0x54] sm:$0xf]  ;;  %v472_v15 = vld [vmem:[%s837_s1 + $0x58] sm:$0xf0] }
   0x5   :  { %152 = vmatpush.bf16.msra.mxu1 %v491_v7  ;;  %v471_v16 = vor.u32 %v567_v13, %v470_v12  ;;  %v475_v17 = vor.u32 %v566_v14, %v472_v15  ;;  %v462_v18 = vld [vmem:[%s837_s1 + $0x40] sm:$0xf]  ;;  %v565_v19 = vld [vmem:[%s837_s1 + $0x44] sm:$0xf0]  ;;  %v564_v20 = vld [vmem:[%s837_s1 + $0x44] sm:$0xf] }
   0x6   :  { %v464_v21 = vld [vmem:[%s837_s1 + $0x48] sm:$0xf0]  ;;  %v463_v22 = vor.u32 %v565_v19, %v462_v18  ;;  %v579_v23 = vld [vmem:[%s839_s3 + $0x38] sm:$0xff]  ;;  %v454_v26 = vld [vmem:[%s837_s1 + $0x30] sm:$0xf] }
   0x7   :  { %v587_v24 = vld [vmem:[%s839_s3 + $0x78] sm:$0xff]  ;;  %v467_v25 = vor.u32 %v564_v20, %v464_v21  ;;  %v562_v28 = vld [vmem:[%s837_s1 + $0x34] sm:$0xf]  ;;  %302 = vmatpush.bf16.msra.mxu2 %v579_v23 }
   0x8   :  { %139 = vmatpush.bf16.msra.mxu0 %v479_v10  ;;  %v563_v27 = vld [vmem:[%s837_s1 + $0x34] sm:$0xf0]  ;;  %v456_v29 = vld [vmem:[%s837_s1 + $0x38] sm:$0xf0]  ;;  %316 = vmatpush.bf16.msra.mxu3 %v587_v24  ;;  %v578_v30 = vld [vmem:[%s839_s3 + $0x30] sm:$0xff] }
   0x9   :  { %153 = vmatpush.bf16.msra.mxu1 %v483_v11  ;;  %v586_v31 = vld [vmem:[%s839_s3 + $0x70] sm:$0xff]  ;;  %v455_v32 = vor.u32 %v563_v27, %v454_v26 }
   0xc   :  { %140 = vmatpush.bf16.msra.mxu0 %v471_v16 }
   0xd   :  { %154 = vmatpush.bf16.msra.mxu1 %v475_v17 }
  0x10   :  { %141 = vmatpush.bf16.msra.mxu0 %v463_v22 }
  0x11   :  { %12 = vsyncpa [#allocation4], 0  ;;  %155 = vmatpush.bf16.msra.mxu1 %v467_v25  ;;  %v459_v33 = vor.u32 %v562_v28, %v456_v29  ;;  %v446_v34 = vld [vmem:[%s837_s1 + $0x20] sm:$0xf]  ;;  %v561_v35 = vld [vmem:[%s837_s1 + $0x24] sm:$0xf0]  ;;  %303 = vmatpush.bf16.msra.mxu2 %v578_v30 }
  0x12   :  { %v560_v36 = vld [vmem:[%s837_s1 + $0x24] sm:$0xf]  ;;  %v448_v37 = vld [vmem:[%s837_s1 + $0x28] sm:$0xf0]  ;;  %317 = vmatpush.bf16.msra.mxu3 %v586_v31  ;;  %v447_v40 = vor.u32 %v561_v35, %v446_v34  ;;  %v438_v42 = vld [vmem:[%s837_s1 + $0x10] sm:$0xf] }
  0x13   :  { %v577_v38 = vld [vmem:[%s839_s3 + $0x28] sm:$0xff]  ;;  %v451_v41 = vor.u32 %v560_v36, %v448_v37  ;;  %v559_v43 = vld [vmem:[%s837_s1 + $0x14] sm:$0xf0]  ;;  %v558_v44 = vld [vmem:[%s837_s1 + $0x14] sm:$0xf]  ;;  %v627_v31 = vmov 128.0  }
  0x14   :  { %v585_v39 = vld [vmem:[%s839_s3 + $0x68] sm:$0xff]  ;;  %142 = vmatpush.bf16.msra.mxu0 %v455_v32  ;;  %v440_v45 = vld [vmem:[%s837_s1 + $0x18] sm:$0xf0]  ;;  %v576_v46 = vld [vmem:[%s839_s3 + $0x20] sm:$0xff]  ;;  %v439_v48 = vor.u32 %v559_v43, %v438_v42  ;;  %595 = vrcp.f32 %v627_v31  ;;  %s416_s15 = sshll.u32 %s843_s7, 4  ;;  %s417_s15 = int_to_ptr.hbm [resolvable:$true] %s416_s15 }
  0x15   :  { %156 = vmatpush.bf16.msra.mxu1 %v459_v33  ;;  %304 = vmatpush.bf16.msra.mxu2 %v577_v38  ;;  %v584_v47 = vld [vmem:[%s839_s3 + $0x60] sm:$0xff]  ;;  %v443_v49 = vor.u32 %v558_v44, %v440_v45  ;;  %v557_v51 = vld [vmem:[%s837_s1 + $0x4] sm:$0xf0]  ;;  %v432_v53 = vld [vmem:[%s837_s1 + $0x8] sm:$0xf0] }
  0x16   :  { %318 = vmatpush.bf16.msra.mxu3 %v585_v39  ;;  %v430_v50 = vld [vmem:[%s837_s1] sm:$0xf]  ;;  %v556_v52 = vld [vmem:[%s837_s1 + $0x4] sm:$0xf]  ;;  %v34_v56 = vld [vmem:[%s836_s0 + $0x8] sm:$0xff]  ;;  %s630_s1 = smov 8  }
  0x17   :  { %v431_v54 = vor.u32 %v557_v51, %v430_v50  ;;  %v33_v55 = vld [vmem:[%s836_s0] sm:$0xff]  ;;  %v435_v57 = vor.u32 %v556_v52, %v432_v53  ;;  %v575_v59 = vld [vmem:[%s839_s3 + $0x18] sm:$0xff]  ;;  %v574_v61 = vld [vmem:[%s839_s3 + $0x10] sm:$0xff] }
  0x18   :  { %143 = vmatpush.bf16.msra.mxu0 %v447_v40  ;;  %v35_v58 = vpack.c.bf16 %v34_v56, %v33_v55  ;;  %v583_v60 = vld [vmem:[%s839_s3 + $0x58] sm:$0xff]  ;;  %v582_v62 = vld [vmem:[%s839_s3 + $0x50] sm:$0xff]  ;;  %v573_v63 = vld [vmem:[%s839_s3 + $0x8] sm:$0xff] }
  0x19   :  { %157 = vmatpush.bf16.msra.mxu1 %v451_v41  ;;  %305 = vmatpush.bf16.msra.mxu2 %v576_v46  ;;  %v581_v0 = vld [vmem:[%s839_s3 + $0x48] sm:$0xff]  ;;  %v572_v1 = vld [vmem:[%s839_s3] sm:$0xff] }
  0x1a   :  { %319 = vmatpush.bf16.msra.mxu3 %v584_v47  ;;  %v580_v2 = vld [vmem:[%s839_s3 + $0x40] sm:$0xff]  ;;  %v596_v32 = vpop.eup %595 }
  0x1b   :  { %v52_v3 = vld [vmem:[%s838_s2] sm:$0x3]  ;;  %v354_v33 = vmul.f32 128.0, %v596_v32  ;;  %vm358_vm0 = vweird.f32 %v596_v32 }
  0x1c   :  { %144 = vmatpush.bf16.msra.mxu0 %v439_v48  ;;  %v54_v6 = vperm.slane %v52_v3, 0  ;;  %v55_v7 = vperm.slane %v52_v3, 1  ;;  %v592_v21 = vld [vmem:[%s840_s4] ss:$0 sm:$0xff] }
  0x1d   :  { %158 = vmatpush.bf16.msra.mxu1 %v443_v49  ;;  %306 = vmatpush.bf16.msra.mxu2 %v575_v59  ;;  %v355_v34 = vsub.f32 1.0, %v354_v33 }
  0x1e   :  { %320 = vmatpush.bf16.msra.mxu3 %v583_v60  ;;  %v593_v60 = vld [vmem:[%s841_s5] ss:$0 sm:$0xff]  ;;  %s628_s5 = smov [#allocation3]  }
  0x1f   :  { %v356_v35 = vmul.f32 %v596_v32, %v355_v34  ;;  %s414_s12 = sshll.u32 %s628_s5, 4  ;;  %s415_s12 = int_to_ptr.vmem [resolvable:$true] %s414_s12 }
  0x20   :  { %145 = vmatpush.bf16.msra.mxu0 %v431_v54 }
  0x21   :  { %159 = vmatpush.bf16.msra.mxu1 %v435_v57  ;;  %307 = vmatpush.bf16.msra.mxu2 %v574_v61  ;;  %v357_v36 = vadd.f32 %v596_v32, %v356_v35 }
  0x22   :  { %321 = vmatpush.bf16.msra.mxu3 %v582_v62 }
  0x23   :  { %146 = vmatmul.bf16.vlgmr.msra.gmra.mxu0 %v35_v58  ;;  %v359_v37 = vsel %vm358_vm0, %v596_v32, %v357_v36 }
  0x24   :  { %160 = vmatmul.bf16.vlgmr.msra.gmra.mxu1 %v35_v58 }
  0x25   :  { %308 = vmatpush.bf16.msra.mxu2 %v573_v63 }
  0x26   :  { %322 = vmatpush.bf16.msra.mxu3 %v581_v0  ;;  %v594_v0 = vld [vmem:[%s842_s6] ss:$0 sm:$0xff]  ;;  %s629_s6 = smov 128  }
  0x29   :  { %309 = vmatpush.bf16.msra.mxu2 %v572_v1 }
  0x2a   :  { %323 = vmatpush.bf16.msra.mxu3 %v580_v2 }
  0xa0   :  { %v147_v4 = vpop.f32.mrf.mxu0 }
  0xa1   :  { %v161_v5 = vpop.f32.mrf.mxu1  ;;  %v148_v8 = vadd.f32 %v147_v4, %v54_v6 }
  0xa2   :  { %v162_v9 = vadd.f32 %v161_v5, %v55_v7 }
  0xa3   :  { %v166_v14 = vmax.f32 %v148_v8, 0.0 }
  0xa4   :  { %v167_v16 = vmax.f32 %v162_v9, 0.0 }
  0xa8   :  { %v149_v10 = vpop.f32.mrf.mxu0 }
  0xa9   :  { %v150_v11 = vadd.f32 %v149_v10, %v54_v6  ;;  %v163_v12 = vpop.f32.mrf.mxu1 }
  0xaa   :  { %v164_v13 = vadd.f32 %v163_v12, %v55_v7 }
  0xab   :  { %v168_v15 = vmax.f32 %v150_v11, 0.0 }
  0xac   :  { %v169_v17 = vmax.f32 %v164_v13, 0.0 }
  0xad   :  { %v172_v18 = vpack.c.bf16 %v168_v15, %v166_v14 }
  0xae   :  { %v173_v19 = vpack.c.bf16 %v169_v17, %v167_v16 }
  0xaf   :  { %310 = vmatmul.bf16.vlgmr.msra.gmra.mxu2 %v172_v18 }
  0xb0   :  { %324 = vmatmul.bf16.vlgmr.msra.gmra.mxu3 %v173_v19 }
 0x132   :  { %v311_v20 = vpop.f32.mrf.mxu2 }
 0x133   :  { %v325_v22 = vpop.f32.mrf.mxu3 }
 0x134   :  { %v326_v23 = vadd.f32 %v325_v22, %v311_v20 }
 0x136   :  { %v343_v24 = vadd.f32 %v592_v21, %v326_v23 }
 0x138   :  { %v347_v25 = vadd.f32 %v343_v24, %v33_v55 }
 0x13a   :  { %349 = vadd.xlane.f32.xlu0 %v347_v25  ;;  %v313_v26 = vpop.f32.mrf.mxu2 }
 0x13b   :  { %v327_v27 = vpop.f32.mrf.mxu3 }
 0x13c   :  { %v328_v28 = vadd.f32 %v327_v27, %v313_v26 }
 0x13e   :  { %v344_v29 = vadd.f32 %v592_v21, %v328_v28 }
 0x140   :  { %v348_v30 = vadd.f32 %v344_v29, %v34_v56 }
 0x142   :  { %351 = vadd.xlane.f32.xlu0 %v348_v30 }
 0x1ad   :  { %v350_v38 = vpop.xlane.xlu0 %349 }
 0x1ae   :  { %v360_v39 = vmul.f32 %v359_v37, %v350_v38 }
 0x1b0   :  { %v362_v40 = vsub.f32 %v347_v25, %v360_v39 }
 0x1b2   :  { %v364_v41 = vmul.f32 %v362_v40, %v362_v40 }
 0x1b4   :  { %366 = vadd.xlane.f32.xlu1 %v364_v41 }
 0x1b5   :  { %v352_v42 = vpop.xlane.xlu0 %351 }
 0x1b6   :  { %v361_v43 = vmul.f32 %v359_v37, %v352_v42 }
 0x1b8   :  { %v363_v44 = vsub.f32 %v348_v30, %v361_v43 }
 0x1ba   :  { %v365_v45 = vmul.f32 %v363_v44, %v363_v44 }
 0x1bc   :  { %368 = vadd.xlane.f32.xlu1 %v365_v45 }
 0x227   :  { %v367_v46 = vpop.xlane.xlu1 %366 }
 0x228   :  { %v370_v47 = vmul.f32 %v367_v46, %v359_v37 }
 0x22a   :  { %v372_v48 = vadd.f32 1e-05, %v370_v47 }
 0x22c   :  { %597 = vrsqrt.f32 %v372_v48  ;;  %vm380_vm2 = vweird.f32 %v372_v48 }
 0x22f   :  { %v369_v49 = vpop.xlane.xlu1 %368 }
 0x230   :  { %v371_v50 = vmul.f32 %v369_v49, %v359_v37 }
 0x232   :  { %v598_v51 = vpop.eup %597  ;;  %v373_v52 = vadd.f32 1e-05, %v371_v50 }
 0x233   :  { %v375_v53 = vmul.f32 %v598_v51, %v372_v48  ;;  %vm381_vm1 = vweird.f32 %v598_v51 }
 0x234   :  { %599 = vrsqrt.f32 %v373_v52  ;;  %vm382_vm3 = vmor %vm380_vm2, %vm381_vm1  ;;  %vm390_vm5 = vweird.f32 %v373_v52 }
 0x235   :  { %v376_v54 = vmul.f32 %v598_v51, %v375_v53 }
 0x237   :  { %v377_v55 = vmul.f32 0.5, %v376_v54 }
 0x239   :  { %v378_v56 = vsub.f32 1.5, %v377_v55 }
 0x23a   :  { %v600_v57 = vpop.eup %599 }
 0x23b   :  { %v379_v58 = vmul.f32 %v598_v51, %v378_v56  ;;  %v385_v59 = vmul.f32 %v600_v57, %v373_v52  ;;  %vm391_vm4 = vweird.f32 %v600_v57 }
 0x23c   :  { %vm392_vm6 = vmor %vm390_vm5, %vm391_vm4 }
 0x23d   :  { %v383_v61 = vsel %vm382_vm3, %v598_v51, %v379_v58  ;;  %v386_v62 = vmul.f32 %v600_v57, %v385_v59 }
 0x23e   :  { %v394_v63 = vmul.f32 %v383_v61, %v362_v40 }
 0x23f   :  { %v387_v1 = vmul.f32 0.5, %v386_v62 }
 0x240   :  { %v400_v2 = vmul.f32 %v593_v60, %v394_v63 }
 0x241   :  { %v388_v3 = vsub.f32 1.5, %v387_v1 }
 0x242   :  { %v406_v4 = vadd.f32 %v594_v0, %v400_v2 }
 0x243   :  { %v389_v5 = vmul.f32 %v600_v57, %v388_v3 }
 0x244   :  { %408 = vst [vmem:[#allocation3] sm:$0xff] %v406_v4 }
 0x245   :  { %v393_v6 = vsel %vm392_vm6, %v600_v57, %v389_v5 }
 0x246   :  { %v395_v7 = vmul.f32 %v393_v6, %v363_v44 }
 0x248   :  { %v401_v8 = vmul.f32 %v593_v60, %v395_v7 }
 0x24a   :  { %v407_v9 = vadd.f32 %v594_v0, %v401_v8 }
 0x24c   :  { %409 = vst [vmem:[#allocation3 + $0x8] sm:$0xff] %v407_v9 }
 0x24d   :  { %422 = dma.vmem_to_hbm [thread:$0]  %s415_s12, 256, %s417_s15, [#allocation4], %s629_s6, %s629_s6, %s630_s1  }
 0x24e   :  { %625 = dma.done.wait [#allocation4], 256  }
 0x24f   :  { %626 = vsyncadd [#allocation4], 4294967040 }
 0x250   :  { %427 = vsyncpa [#allocation4], 1 }

// kernel: decoder_layer.10
= control target key start
LH: loop header
LB: loop body
LE: loop exit
PB: predicated region body
PF: predicated region fallthrough
CT: control target
= control target key end

     0   :  { %s1030_s27 = smov 0   ;;  %s1123_s0 = inlined_call_operand.vmem [shape: bf16[2,8,128], index: 0, kind: input, shape index: {}]   ;;  %s1124_s1 = inlined_call_operand.vmem [shape: bf16[2,8,256], index: 1, kind: input, shape index: {}, may-alias: {1,2}]   ;;  %s1125_s2 = inlined_call_operand.vmem [shape: bf16[2,8,256], index: 2, kind: input, shape index: {}, may-alias: {1,2}]   ;;  %s1126_s3 = inlined_call_operand.vmem [shape: f32[2,8,128], index: 3, kind: input, shape index: {}]   ;;  %s1127_s4 = inlined_call_operand.vmem [shape: bf16[128,128], index: 4, kind: input, shape index: {}]   ;;  %s1128_s5 = inlined_call_operand.vmem [shape: f32[1,128], index: 5, kind: input, shape index: {}]   ;;  %s1129_s6 = inlined_call_operand.vmem [shape: f32[1,128], index: 6, kind: input, shape index: {}]   ;;  %s1130_s7 = inlined_call_operand.vmem [shape: f32[1,128], index: 7, kind: input, shape index: {}]   ;;  %s1131_s8 = inlined_call_operand.vmem [shape: f32[2,8,128], index: 8, kind: output, shape index: {}]  }
   0x1 LB: > { %s869_s28 = sadd.s32 4294967295, %s979_s27   ;;  %p873_p0 = scmp.ge.s32.totalorder %s979_s27, 1  ;;  %s979_s27 = sphi %s1030_s27, %s18_s27  }
   0x2   : > { %p291_p1 = scmp.lt.s32.totalorder %s979_s27, 3 }
   0x4   : > { %p292_p2 = pnand %p873_p0, %p291_p1 }
   0x5   : > { %p338_p3 = scmp.lt.s32.totalorder (!%p292_p2), %s869_s28, 1  ;;  %s981_s15 = smov (!%p292_p2), 96  }
   0x6   : > { %295 = sbr.rel (%p292_p2) target bundleno = 1233 (0x4d1), region = 52  ;;  %s982_s19 = smov (!%p292_p2), 32  }
   0x7   : > { %s983_s20 = smov (!%p292_p2), 64  }
   0xb   : > { %s1133_s28 = smov (!%p338_p3, %s869_s28), 1  ;;  %vm365_vm0 = vcmask 261120   ;;  %vm385_vm1 = vcmask 64512   ;;  %vm400_vm2 = vcmask 1043456   ;;  %v931_v28 = vld [vmem:[%s1127_s4 + $0x8] sm:$0xff]  ;;  %v930_v29 = vld [vmem:[%s1127_s4] sm:$0xff] }
   0xc   : > { %s1038_s29 = sshll.u32 %s1133_s28, 3  ;;  %s874_s30 = sshll.u32 %s1133_s28, 2  ;;  %v933_v51 = vld [vmem:[%s1127_s4 + $0x18] sm:$0xff]  ;;  %v932_v52 = vld [vmem:[%s1127_s4 + $0x10] sm:$0xff] }
   0xd   : > { %s346_s11 = scalar_lea.vmem %s1124_s1, %s1038_s29  ;;  %s341_s14 = scalar_lea.vmem %s1123_s0, %s874_s30 }
   0xe   : > { %v363_v0 = vld [vmem:[%s346_s11] sm:$0xf]  ;;  %s821_s18 = scalar_lea.vmem %s1125_s2, %s1038_s29  ;;  %s356_s21 = scalar_lea.vmem %s1126_s3, %s1038_s29 }
   0xf   : > { %v370_v1 = vsel %vm365_vm0, %v363_v0, 0  ;;  %v429_v2 = vunpack.c.l.b16 %v363_v0  ;;  %v362_v3 = vld [vmem:[%s341_s14] sm:$0xf]  ;;  %v881_v7 = vld [vmem:[%s821_s18 + $0x4] sm:$0xf]  ;;  %s360_s30 = scalar_lea.vmem %s1131_s8, %s1038_s29 }
  0x10   : > { %379 = vmatpush.bf16.xpose.msra.mxu0 %v370_v1  ;;  %v424_v5 = vunpack.c.l.b16 %v362_v3  ;;  %v464_v8 = vunpack.c.l.b16 %v881_v7  ;;  %v402_v16 = vsel %vm400_vm2, %v881_v7, 0 }
  0x11   : > { %v430_v4 = vpack.c.b16 %v429_v2, %v429_v2  ;;  %411 = vmatpush.bf16.msra.mxu1 %v402_v16 }
  0x12   : > { %v425_v6 = vpack.c.b16 %v424_v5, %v424_v5  ;;  %v465_v9 = vpack.c.b16 %v464_v8, %v464_v8 }
  0x13   : > { %431 = vrot.lane.b32.xlu0 %v430_v4, %s981_s15 }
  0x14   : > { %466 = vrot.lane.b32.xlu2 %v465_v9, %s981_s15 }
  0x15   : > { %514 = vmatpush.bf16.msrb.mxu1 %v933_v51 }
  0x17   : > { %882 = vmatmul.msk.bf16.vlgmr.msra.gmra.mxu0 %vm365_vm0, %v362_v3 }
  0x19   : > { %515 = vmatpush.bf16.msrb.mxu1 %v932_v52 }
  0x1b   : > { %426 = vrot.lane.b32.xlu0 %v425_v6, %s981_s15 }
  0x23   : > { %641 = vrot.lane.b32.xlu0 %v430_v4, %s982_s19 }
  0x2b   : > { %639 = vrot.lane.b32.xlu0 %v425_v6, %s982_s19 }
  0x33   : > { %549 = vrot.lane.b32.xlu0 %v425_v6, %s983_s20 }
  0x6e   : > { %v467_v20 = vpop.permute.xlu2 %466 }
  0x6f   : > { %v472_v21 = vsel %vm400_vm2, %v467_v20, 0  ;;  %v937_v20 = vld [vmem:[%s1127_s4 + $0x38] sm:$0xff] }
  0x70   : > { %481 = vmatpush.bf16.msra.mxu3 %v472_v21  ;;  %v936_v21 = vld [vmem:[%s1127_s4 + $0x30] sm:$0xff] }
  0x74   : > { %542 = vmatpush.bf16.msrb.mxu3 %v931_v28 }
  0x78   : > { %543 = vmatpush.bf16.msrb.mxu3 %v930_v29 }
  0x85   : > { %v432_v10 = vpop.permute.xlu0 %431 }
  0x86   : > { %v437_v11 = vsel %vm365_vm0, %v432_v10, 0 }
  0x87   : > { %446 = vmatpush.bf16.xpose.msra.mxu2 %v437_v11 }
  0x8d   : > { %v427_v12 = vpop.permute.xlu0 %426 }
  0x8e   : > { %884 = vmatmul.msk.bf16.vlgmr.msra.gmra.mxu2 %vm365_vm0, %v427_v12 }
  0x94   : > { %v381_v13 = vpop.f32.mrf.mxu0 }
  0x95   : > { %v386_v14 = vsel %vm385_vm1, %v381_v13, -inf  ;;  %v642_v34 = vpop.permute.xlu0 %641 }
  0x96   : > { %387 = vmax.xlane.f32.xlu1 %v386_v14  ;;  %v647_v38 = vsel %vm365_vm0, %v642_v34, 0 }
  0x9c   : > { %v383_v15 = vpop.f32.mrf.mxu0 }
  0x9d   : > { %v640_v41 = vpop.permute.xlu0 %639 }
  0xa5   : > { %v550_v50 = vpop.permute.xlu0 %549 }
 0x109   : > { %v388_v17 = vpop.xlane.xlu1 %387 }
 0x10a   : > { %v389_v18 = vsub.f32 %v381_v13, %v388_v17 }
 0x10c   : > { %v390_v19 = vmul.f32 1.442695, %v389_v18  ;;  %v935_v18 = vld [vmem:[%s1127_s4 + $0x28] sm:$0xff] }
 0x10e   : > { %953 = vpow2.f32 %v390_v19  ;;  %v934_v19 = vld [vmem:[%s1127_s4 + $0x20] sm:$0xff] }
 0x111   : > { %v448_v22 = vpop.f32.mrf.mxu2 }
 0x112   : > { %v452_v23 = vsel %vm385_vm1, %v448_v22, -inf }
 0x113   : > { %453 = vmax.xlane.f32.xlu1 %v452_v23 }
 0x114   : > { %v954_v24 = vpop.eup %953 }
 0x115   : > { %v392_v25 = vsel %vm385_vm1, %v954_v24, 0.0  ;;  %v396_v26 = vpack.c.bf16 %v954_v24, %v954_v24 }
 0x116   : > { %393 = vadd.xlane.f32.xlu2 %v392_v25 }
 0x117   : > { %883 = vmatmul.msk.bf16.vlgmr.msra.gmra.mxu1 %vm385_vm1, %v396_v26 }
 0x118   : > { %631 = vmatpush.bf16.msra.mxu1 %v935_v18 }
 0x119   : > { %v450_v27 = vpop.f32.mrf.mxu2 }
 0x11c   : > { %632 = vmatpush.bf16.msra.mxu1 %v934_v19 }
 0x12c   : > { %551 = vrot.lane.b32.xlu1 %v430_v4, %s983_s20 }
 0x12e   : > { %583 = vrot.lane.b32.xlu2 %v465_v9, %s983_s20 }
 0x136   : > { %673 = vrot.lane.b32.xlu2 %v465_v9, %s982_s19 }
 0x186   : > { %v454_v30 = vpop.xlane.xlu1 %453 }
 0x187   : > { %v455_v31 = vsub.f32 %v448_v22, %v454_v30 }
 0x189   : > { %v456_v32 = vmul.f32 1.442695, %v455_v31  ;;  %v394_v33 = vpop.xlane.xlu2 %393 }
 0x18b   : > { %955 = vpow2.f32 %v456_v32 }
 0x18c   : > { %957 = vrcp.f32 %v394_v33 }
 0x191   : > { %v956_v35 = vpop.eup %955  ;;  %v584_v40 = vpop.permute.xlu2 %583 }
 0x192   : > { %v458_v36 = vsel %vm385_vm1, %v956_v35, 0.0  ;;  %v462_v37 = vpack.c.bf16 %v956_v35, %v956_v35  ;;  %v958_v43 = vpop.eup %957  ;;  %v589_v3 = vsel %vm400_vm2, %v584_v40, 0 }
 0x193   : > { %459 = vadd.xlane.f32.xlu2 %v458_v36  ;;  %598 = vmatpush.bf16.msrb.mxu2 %v589_v3  ;;  %v952_v3 = vld [vmem:[%s1130_s7] ss:$0 sm:$0xff] }
 0x194   : > { %v413_v39 = vpop.f32.mrf.mxu1  ;;  %885 = vmatmul.msk.bf16.vlgmr.msra.gmra.mxu3 %vm385_vm1, %v462_v37 }
 0x195   : > { %656 = vmatpush.bf16.xpose.msra.mxu3 %v647_v38  ;;  %v417_v45 = vmul.f32 %v958_v43, %v413_v39  ;;  %v950_v38 = vld [vmem:[%s1128_s5] ss:$0 sm:$0xff] }
 0x197   : > { %v418_v49 = vpack.c.bf16 %v417_v45, %v417_v45  ;;  %721 = vmatpush.bf16.msra.mxu2 %v937_v20  ;;  %v984_v45 = vmov 128.0  }
 0x199   : > { %v674_v44 = vpop.permute.xlu2 %673 }
 0x19a   : > { %v679_v47 = vsel %vm400_vm2, %v674_v44, 0 }
 0x19b   : > { %722 = vmatpush.bf16.msra.mxu2 %v936_v21 }
 0x19c   : > { %v415_v42 = vpop.f32.mrf.mxu1 }
 0x19e   : > { %v552_v46 = vpop.permute.xlu1 %551 }
 0x19f   : > { %v557_v48 = vsel %vm365_vm0, %v552_v46, 0 }
 0x1a0   : > { %566 = vmatpush.bf16.xpose.msrb.mxu0 %v557_v48 }
 0x1a4   : > { %903 = vmatmul.msk.bf16.vlgmr.msrb.gmra.mxu3 %vm365_vm0, %v418_v49 }
 0x1a7   : > { %904 = vmatmul.msk.bf16.vlgmr.msrb.gmra.mxu0 %vm365_vm0, %v550_v50 }
 0x1a8   : > { %688 = vmatpush.bf16.msra.mxu0 %v679_v47 }
 0x1b4   : > { %915 = vmatmul.msk.bf16.vlgmr.msra.gmra.mxu3 %vm365_vm0, %v640_v41  ;;  %v734_v41 = vld [vmem:[%s356_s21] sm:$0xff] }
 0x206   : > { %v460_v53 = vpop.xlane.xlu2 %459 }
 0x207   : > { %959 = vrcp.f32 %v460_v53 }
 0x20d   : > { %v960_v54 = vpop.eup %959 }
 0x217   : > { %v483_v55 = vpop.f32.mrf.mxu3 }
 0x218   : > { %v487_v56 = vmul.f32 %v960_v54, %v483_v55 }
 0x21a   : > { %v488_v57 = vpack.c.bf16 %v487_v56, %v487_v56 }
 0x21c   : > { %894 = vmatmul.msk.bf16.vlgmr.msrb.gmra.mxu1 %vm365_vm0, %v488_v57 }
 0x21f   : > { %v485_v58 = vpop.f32.mrf.mxu3 }
 0x224   : > { %v568_v59 = vpop.f32.mrf.mxu0 }
 0x225   : > { %v572_v60 = vsel %vm385_vm1, %v568_v59, -inf }
 0x226   : > { %573 = vmax.xlane.f32.xlu0 %v572_v60 }
 0x227   : > { %v545_v61 = vpop.f32.mrf.mxu3 }
 0x22c   : > { %v570_v62 = vpop.f32.mrf.mxu0 }
 0x22f   : > { %v547_v63 = vpop.f32.mrf.mxu3 }
 0x237   : > { %v658_v0 = vpop.f32.mrf.mxu3 }
 0x238   : > { %v662_v1 = vsel %vm385_vm1, %v658_v0, -inf }
 0x239   : > { %663 = vmax.xlane.f32.xlu1 %v662_v1  ;;  %v951_v1 = vld [vmem:[%s1129_s6] ss:$0 sm:$0xff] }
 0x23f   : > { %v660_v2 = vpop.f32.mrf.mxu3 }
 0x299   : > { %v517_v4 = vpop.f32.mrf.mxu1  ;;  %v574_v5 = vpop.xlane.xlu0 %573 }
 0x29a   : > { %v575_v6 = vsub.f32 %v568_v59, %v574_v5  ;;  %v546_v36 = vadd.f32 %v545_v61, %v517_v4 }
 0x29c   : > { %v576_v7 = vmul.f32 1.442695, %v575_v6 }
 0x29e   : > { %961 = vpow2.f32 %v576_v7 }
 0x2a1   : > { %v519_v8 = vpop.f32.mrf.mxu1 }
 0x2a4   : > { %v962_v9 = vpop.eup %961 }
 0x2a5   : > { %v578_v10 = vsel %vm385_vm1, %v962_v9, 0.0  ;;  %v582_v11 = vpack.c.bf16 %v962_v9, %v962_v9 }
 0x2a6   : > { %579 = vadd.xlane.f32.xlu1 %v578_v10 }
 0x2a7   : > { %905 = vmatmul.msk.bf16.vlgmr.msrb.gmra.mxu2 %vm385_vm1, %v582_v11 }
 0x2ac   : > { %v664_v12 = vpop.xlane.xlu1 %663 }
 0x2ad   : > { %v665_v13 = vsub.f32 %v658_v0, %v664_v12 }
 0x2af   : > { %v666_v14 = vmul.f32 1.442695, %v665_v13 }
 0x2b1   : > { %963 = vpow2.f32 %v666_v14 }
 0x2b7   : > { %v964_v15 = vpop.eup %963 }
 0x2b8   : > { %v672_v16 = vpack.c.bf16 %v964_v15, %v964_v15  ;;  %v668_v17 = vsel %vm385_vm1, %v964_v15, 0.0 }
 0x2b9   : > { %669 = vadd.xlane.f32.xlu0 %v668_v17 }
 0x2ba   : > { %916 = vmatmul.msk.bf16.vlgmr.msra.gmra.mxu0 %vm385_vm1, %v672_v16 }
 0x319   : > { %v580_v22 = vpop.xlane.xlu1 %579 }
 0x31a   : > { %965 = vrcp.f32 %v580_v22 }
 0x320   : > { %v966_v23 = vpop.eup %965 }
 0x32a   : > { %v600_v24 = vpop.f32.mrf.mxu2 }
 0x32b   : > { %v604_v25 = vmul.f32 %v966_v23, %v600_v24 }
 0x32c   : > { %v670_v27 = vpop.xlane.xlu0 %669 }
 0x32d   : > { %v605_v26 = vpack.c.bf16 %v604_v25, %v604_v25  ;;  %967 = vrcp.f32 %v670_v27 }
 0x32e   : > { %969 = vrcp.f32 %v984_v45 }
 0x32f   : > { %914 = vmatmul.msk.bf16.vlgmr.msra.gmra.mxu1 %vm365_vm0, %v605_v26 }
 0x332   : > { %v602_v28 = vpop.f32.mrf.mxu2 }
 0x333   : > { %v968_v29 = vpop.eup %967 }
 0x334   : > { %v970_v46 = vpop.eup %969 }
 0x335   : > { %v739_v47 = vmul.f32 128.0, %v970_v46  ;;  %vm743_vm3 = vweird.f32 %v970_v46 }
 0x337   : > { %v690_v30 = vpop.f32.mrf.mxu0  ;;  %v740_v48 = vsub.f32 1.0, %v739_v47 }
 0x338   : > { %v694_v31 = vmul.f32 %v968_v29, %v690_v30 }
 0x339   : > { %v741_v49 = vmul.f32 %v970_v46, %v740_v48 }
 0x33a   : > { %v695_v32 = vpack.c.bf16 %v694_v31, %v694_v31 }
 0x33b   : > { %v742_v50 = vadd.f32 %v970_v46, %v741_v49 }
 0x33c   : > { %925 = vmatmul.msk.bf16.vlgmr.msra.gmra.mxu2 %vm365_vm0, %v695_v32 }
 0x33d   : > { %v744_v51 = vsel %vm743_vm3, %v970_v46, %v742_v50 }
 0x33f   : > { %v692_v33 = vpop.f32.mrf.mxu0 }
 0x3ac   : > { %v634_v34 = vpop.f32.mrf.mxu1 }
 0x3ad   : > { %v638_v37 = vadd.f32 %v634_v34, %v546_v36 }
 0x3b4   : > { %v636_v35 = vpop.f32.mrf.mxu1 }
 0x3bf   : > { %v724_v39 = vpop.f32.mrf.mxu2 }
 0x3c0   : > { %v728_v40 = vadd.f32 %v724_v39, %v638_v37 }
 0x3c2   : > { %v733_v42 = vadd.f32 %v950_v38, %v728_v40 }
 0x3c4   : > { %v735_v43 = vadd.f32 %v734_v41, %v733_v42 }
 0x3c6   : > { %736 = vadd.xlane.f32.xlu0 %v735_v43 }
 0x3c7   : > { %v726_v44 = vpop.f32.mrf.mxu2 }
 0x439   : > { %v737_v52 = vpop.xlane.xlu0 %736 }
 0x43a   : > { %v745_v53 = vmul.f32 %v744_v51, %v737_v52 }
 0x43c   : > { %v746_v54 = vsub.f32 %v735_v43, %v745_v53 }
 0x43e   : > { %v747_v55 = vmul.f32 %v746_v54, %v746_v54 }
 0x440   : > { %748 = vadd.xlane.f32.xlu1 %v747_v55 }
 0x4b3   : > { %v749_v56 = vpop.xlane.xlu1 %748 }
 0x4b4   : > { %v750_v57 = vmul.f32 %v749_v56, %v744_v51 }
 0x4b6   : > { %v751_v58 = vadd.f32 1e-05, %v750_v57 }
 0x4b8   : > { %971 = vrsqrt.f32 %v751_v58  ;;  %vm758_vm5 = vweird.f32 %v751_v58 }
 0x4be   : > { %v972_v59 = vpop.eup %971 }
 0x4bf   : > { %v753_v60 = vmul.f32 %v972_v59, %v751_v58  ;;  %vm759_vm4 = vweird.f32 %v972_v59 }
 0x4c0   : > { %vm760_vm6 = vmor %vm758_vm5, %vm759_vm4 }
 0x4c1   : > { %v754_v61 = vmul.f32 %v972_v59, %v753_v60 }
 0x4c3   : > { %v755_v62 = vmul.f32 0.5, %v754_v61 }
 0x4c5   : > { %v756_v63 = vsub.f32 1.5, %v755_v62 }
 0x4c7   : > { %v757_v0 = vmul.f32 %v972_v59, %v756_v63 }
 0x4c9   : > { %v761_v2 = vsel %vm760_vm6, %v972_v59, %v757_v0 }
 0x4ca   : > { %v762_v4 = vmul.f32 %v761_v2, %v746_v54 }
 0x4cc   : > { %v767_v5 = vmul.f32 %v951_v1, %v762_v4 }
 0x4ce   : > { %v772_v6 = vadd.f32 %v952_v3, %v767_v5 }
 0x4d0   : > { %773 = vst [vmem:[%s360_s30] sm:$0xff] %v772_v6 }
 0x4d1 PF: > { %s18_s27 = sadd.s32 1, %s979_s27  }
 0x4d2   : > { %p15_p4 = scmp.ge.s32.totalorder %s18_s27, 4  }
 0x4d4   :  { %17 = sbr.rel (!%p15_p4) target bundleno = 1 (0x1), region = 91 }

</bundles_post_ra>
